<compile_context>
chip_gen: v7x
topology: tpu7x:2x2x1
jax: 0.10.0
libtpu: 0.0.40
codegen_flags: <defaults>
</compile_context>

<pallas_src>
import functools

import jax
import jax.numpy as jnp
from jax.experimental import pallas as pl
from jax.experimental.pallas import tpu as pltpu


LANE = 128      # TODO(synk): make tile width generation-dependent (256 on v6e/v7x).
SUBLANE = 8


def _round_up(x, m):
    return (x + m - 1) // m * m


# ----------------------------- Pallas kernel ------------------------------- #

def _fused_gcn_kernel(ap_ref, x_ref, w_ref, b_ref, o_ref, *,
                      num_layers, num_nodes, n_p, g_p):
    """Entire GCN forward in one kernel (everything VMEM-resident).

    ap_ref: [Np+Gp, Np]      bf16  rows [0:Np]  = normalized adjacency D^-1/2 (A+I) D^-1/2
                                   rows [Np: ]  = mean-pool matrix P (P[g,n] = 1/|g|)
    x_ref : [Np, Cp]         bf16  node features, zero-padded
    w_ref : [L+1, Cp, Cp]    bf16  conv weights ([C_in, C_out] layout) + readout weight (last)
    b_ref : [L+1, 1, Cp]     f32   conv biases + readout bias (last)
    o_ref : [Gp, Cp]         f32   per-graph logits (padded)
    """
    a = ap_ref[0:n_p, :]                              # normalized adjacency (static slice)
    x = x_ref[...]
    # Valid-node row mask: padded rows must never pick up the bias (keeps the
    # kernel correct for nonzero biases / non-mean pooling).
    row_ids = jax.lax.broadcasted_iota(jnp.int32, (n_p, 1), 0)
    valid = row_ids < num_nodes

    # Static unroll over layers: activations ping-pong through vregs/VMEM,
    # never touching HBM between layers.
    for li in range(num_layers):
        # h = X @ W   (node-wise transform, bf16 MXU, f32 accumulate)
        h = jnp.dot(x, w_ref[li], preferred_element_type=jnp.float32)
        # agg = A_hat @ h   (normalized neighborhood aggregation)
        agg = jnp.dot(a, h.astype(jnp.bfloat16),
                      preferred_element_type=jnp.float32)
        # bias + ReLU + pad-row mask in f32, back to bf16 for the next MXU pass
        act = jnp.maximum(agg + b_ref[li], 0.0)
        x = jnp.where(valid, act, 0.0).astype(jnp.bfloat16)
        # F.dropout(p=0.1) is identity in eval mode (training=False) -> omitted.

    # global mean pool as a matmul, then the readout linear
    p = ap_ref[n_p:n_p + g_p, :]
    pooled = jnp.dot(p, x, preferred_element_type=jnp.float32)
    o_ref[...] = jnp.dot(pooled.astype(jnp.bfloat16), w_ref[num_layers],
                         preferred_element_type=jnp.float32) + b_ref[num_layers]


# ------------------------------ operand packing ----------------------------- #

def _pad2(m, r, c):
    return jnp.pad(m, ((0, r - m.shape[0]), (0, c - m.shape[1])))


def pack_params(params, c_p, num_layers):
    """Pack all weights/biases into two slabs ONCE (outside the per-step jit)."""
    w_mats = [_pad2(w, c_p, c_p) for (w, _) in params["convs"]]
    w_mats.append(_pad2(params["lin_w"], c_p, c_p))
    b_mats = [_pad2(b, 1, c_p) for (_, b) in params["convs"]]
    b_mats.append(_pad2(params["lin_b"], 1, c_p))
    w_slab = jnp.stack(w_mats).astype(jnp.bfloat16)        # [L+1, Cp, Cp]
    b_slab = jnp.stack(b_mats).astype(jnp.float32)         # [L+1, 1, Cp]
    return w_slab, b_slab


def pack_graph(x, a_hat, pool_mat, n_p, c_p, g_p):
    """Pack per-batch graph operands ONCE (outside the per-step jit)."""
    a_p = _pad2(a_hat, n_p, n_p)
    p_p = _pad2(pool_mat, g_p, n_p)
    ap_slab = jnp.concatenate([a_p, p_p], axis=0).astype(jnp.bfloat16)  # [Np+Gp, Np]
    x_p = _pad2(x, n_p, c_p).astype(jnp.bfloat16)                       # [Np, Cp]
    return ap_slab, x_p


# ------------------------------- forward builder ---------------------------- #

def make_gcn_forward(*, num_layers, num_nodes, n_p, g_p, c_p):
    kernel = functools.partial(_fused_gcn_kernel, num_layers=num_layers,
                               num_nodes=num_nodes, n_p=n_p, g_p=g_p)

    # VMEM limit sized from the actual padded operands (+headroom for f32
    # intermediates); clamp to v7x's 64 MiB physical VMEM.
    operand_bytes = (
        (n_p + g_p) * n_p * 2                      # ap_slab  (bf16)
        + n_p * c_p * 2                            # x_p      (bf16)
        + (num_layers + 1) * c_p * c_p * 2         # w_slab   (bf16)
        + (num_layers + 1) * c_p * 4               # b_slab   (f32)
        + g_p * c_p * 4                            # output   (f32)
    )
    vmem_limit = int(min(64 << 20, max(8 << 20, 4 * operand_bytes)))

    flops = (num_layers * (2 * n_p * c_p * c_p + 2 * n_p * n_p * c_p)
             + 2 * g_p * n_p * c_p + 2 * g_p * c_p * c_p)
    cost = pl.CostEstimate(flops=flops, transcendentals=0,
                           bytes_accessed=operand_bytes)

    @jax.jit
    def fwd(ap_slab, x_p, w_slab, b_slab):
        return pl.pallas_call(
            kernel,
            out_shape=jax.ShapeDtypeStruct((g_p, c_p), jnp.float32),
            in_specs=[pl.BlockSpec(memory_space=pltpu.MemorySpace.VMEM)] * 4,
            out_specs=pl.BlockSpec(memory_space=pltpu.MemorySpace.VMEM),
            compiler_params=pltpu.CompilerParams(vmem_limit_bytes=vmem_limit),
            cost_estimate=cost,
        )(ap_slab, x_p, w_slab, b_slab)

    return fwd


# ------------------------------- glue (JAX) -------------------------------- #

def build_norm_adj(edge_index, num_nodes):
    """Dense D^{-1/2}(A + I)D^{-1/2} matching PyG gcn_norm semantics.

    edge_index: int32 [2, E], row 0 = source, row 1 = target.
    A_hat[i, j] multiplies messages flowing j -> i. Duplicate edges accumulate;
    self-loops are only added to nodes without one (add_remaining_self_loops).
    """
    src, dst = edge_index[0], edge_index[1]
    a = jnp.zeros((num_nodes, num_nodes), jnp.float32)
    a = a.at[dst, src].add(1.0)
    diag = jnp.diagonal(a)
    a = a + jnp.diag(jnp.where(diag == 0.0, 1.0, 0.0))
    deg = a.sum(axis=1)                                   # in-degree incl. self loop
    dis = jnp.where(deg > 0, 1.0 / jnp.sqrt(deg), 0.0)
    return dis[:, None] * a * dis[None, :]


def build_pool_matrix(batch, num_graphs):
    """P[g, n] = 1/|graph g| if batch[n] == g else 0  (global_mean_pool)."""
    onehot = (batch[None, :] == jnp.arange(num_graphs)[:, None]).astype(jnp.float32)
    counts = onehot.sum(axis=1, keepdims=True)
    return onehot / jnp.maximum(counts, 1.0)


def init_params(key, in_channels, hidden_channels, out_channels, num_layers):
    """Deterministic synthetic parameters, weights stored [C_in, C_out].

    Biases are nonzero so the padded-row masking in the kernel is exercised.
    """
    params = {"convs": []}
    dims = [in_channels] + [hidden_channels] * num_layers
    keys = jax.random.split(key, 2 * num_layers + 2)
    for li in range(num_layers):
        c_in, c_out = dims[li], dims[li + 1]
        scale = (2.0 / (c_in + c_out)) ** 0.5
        w = scale * jax.random.normal(keys[2 * li], (c_in, c_out), jnp.float32)
        b = 0.1 * jax.random.normal(keys[2 * li + 1], (1, c_out), jnp.float32)
        params["convs"].append((w, b))
    scale = (2.0 / (hidden_channels + out_channels)) ** 0.5
    params["lin_w"] = scale * jax.random.normal(
        keys[-2], (hidden_channels, out_channels), jnp.float32)
    params["lin_b"] = 0.1 * jax.random.normal(
        keys[-1], (1, out_channels), jnp.float32)
    return params


def gcn_reference(x, a_hat, pool_mat, params):
    """Pure-JAX f32 reference of the same forward pass (for sanity checking)."""
    h = x
    for w, b in params["convs"]:
        h = jnp.maximum(a_hat @ (h @ w) + b, 0.0)
    return (pool_mat @ h) @ params["lin_w"] + params["lin_b"]


# --------------------------------- main ------------------------------------ #

if __name__ == "__main__":
    key = jax.random.PRNGKey(0)
    k_x, k_e, k_p = jax.random.split(key, 3)

    # small graph batch: 2 graphs of 8 nodes each
    num_nodes = 16
    num_graphs = 2
    in_channels = 8
    hidden_channels = 32
    out_channels = 4
    num_layers = 6
    num_edges = 40

    x = jax.random.normal(k_x, (num_nodes, in_channels), jnp.float32)
    edge_index = jax.random.randint(k_e, (2, num_edges), 0, num_nodes, jnp.int32)
    batch = jnp.concatenate(
        [jnp.zeros((8,), jnp.int32), jnp.ones((8,), jnp.int32)])

    a_hat = build_norm_adj(edge_index, num_nodes)
    pool_mat = build_pool_matrix(batch, num_graphs)
    params = init_params(k_p, in_channels, hidden_channels, out_channels, num_layers)

    n_p = _round_up(max(num_nodes, SUBLANE), LANE)                 # node dim
    c_p = _round_up(max(in_channels, hidden_channels, out_channels), LANE)
    g_p = _round_up(num_graphs, SUBLANE)                           # graph count

    # All padding / casting / stacking happens ONCE, outside the jitted forward.
    w_slab, b_slab = pack_params(params, c_p, num_layers)          # per-model
    ap_slab, x_p = pack_graph(x, a_hat, pool_mat, n_p, c_p, g_p)   # per-batch

    fwd = make_gcn_forward(num_layers=num_layers, num_nodes=num_nodes,
                           n_p=n_p, g_p=g_p, c_p=c_p)
    out_padded = fwd(ap_slab, x_p, w_slab, b_slab)
    jax.block_until_ready(out_padded)

    out = out_padded[:num_graphs, :out_channels]
    assert out.shape == (num_graphs, out_channels)

    ref = gcn_reference(x, a_hat, pool_mat, params)
    assert bool(jnp.all(jnp.isfinite(out)))
    # loose tolerance: kernel uses bf16 MXU inputs with f32 accumulation
    assert bool(jnp.allclose(out, ref, atol=5e-2, rtol=1e-1)), (out, ref)

    print("KERNEL_OK")
</pallas_src>

<mosaic_0001>
module attributes {stable_mosaic.version = 11 : i64} {
  func.func @_fused_gcn_kernel(%arg0: memref<136x128xbf16, #tpu.memory_space<vmem>>, %arg1: memref<128x128xbf16, #tpu.memory_space<vmem>>, %arg2: memref<7x128x128xbf16, #tpu.memory_space<vmem>>, %arg3: memref<7x1x128xf32, #tpu.memory_space<vmem>>, %arg4: memref<8x128xf32, #tpu.memory_space<vmem>>) attributes {dimension_semantics = [], scalar_prefetch = 0 : i64, scratch_operands = 0 : i64, tpu.core_type = #tpu.core_type<tc>} {
    %c0 = arith.constant 0 : index
    %c0_0 = arith.constant 0 : index
    %0 = vector.load %arg0[%c0, %c0_0] : memref<136x128xbf16, #tpu.memory_space<vmem>>, vector<128x128xbf16>
    %c0_1 = arith.constant 0 : index
    %c0_2 = arith.constant 0 : index
    %1 = vector.load %arg1[%c0_1, %c0_2] : memref<128x128xbf16, #tpu.memory_space<vmem>>, vector<128x128xbf16>
    %2 = tpu.iota {dimensions = array<i32: 0>} : vector<128x1xi32>
    %c16_i32 = arith.constant 16 : i32
    %3 = vector.broadcast %c16_i32 : i32 to vector<128x1xi32>
    %4 = arith.cmpi slt, %2, %3 : vector<128x1xi32>
    %c0_3 = arith.constant 0 : index
    %c0_4 = arith.constant 0 : index
    %c0_5 = arith.constant 0 : index
    %5 = vector.load %arg2[%c0_3, %c0_4, %c0_5] : memref<7x128x128xbf16, #tpu.memory_space<vmem>>, vector<1x128x128xbf16>
    %6 = vector.shape_cast %5 : vector<1x128x128xbf16> to vector<128x128xbf16>
    %cst = arith.constant dense<0.000000e+00> : vector<128x128xf32>
    %7 = tpu.matmul %1, %6, %cst {dimension_numbers = #tpu.dot_dimension_numbers<[1], [0], [0], [1], [0, 0, 1, 1], [], []>} : vector<128x128xbf16>, vector<128x128xbf16>, vector<128x128xf32> -> vector<128x128xf32>
    %8 = arith.truncf %7 : vector<128x128xf32> to vector<128x128xbf16>
    %cst_6 = arith.constant dense<0.000000e+00> : vector<128x128xf32>
    %9 = tpu.matmul %0, %8, %cst_6 {dimension_numbers = #tpu.dot_dimension_numbers<[1], [0], [0], [1], [0, 0, 1, 1], [], []>} : vector<128x128xbf16>, vector<128x128xbf16>, vector<128x128xf32> -> vector<128x128xf32>
    %c0_7 = arith.constant 0 : index
    %c0_8 = arith.constant 0 : index
    %c0_9 = arith.constant 0 : index
    %10 = vector.load %arg3[%c0_7, %c0_8, %c0_9] : memref<7x1x128xf32, #tpu.memory_space<vmem>>, vector<1x1x128xf32>
    %11 = vector.shape_cast %10 : vector<1x1x128xf32> to vector<1x128xf32>
    %12 = vector.broadcast %11 : vector<1x128xf32> to vector<128x128xf32>
    %13 = arith.addf %9, %12 : vector<128x128xf32>
    %cst_10 = arith.constant 0.000000e+00 : f32
    %14 = vector.broadcast %cst_10 : f32 to vector<128x128xf32>
    %15 = arith.maximumf %13, %14 : vector<128x128xf32>
    %cst_11 = arith.constant 0.000000e+00 : f32
    %16 = vector.shape_cast %4 : vector<128x1xi1> to vector<128x1xi1>
    %17 = vector.broadcast %16 : vector<128x1xi1> to vector<128x128xi1>
    %18 = vector.broadcast %cst_11 : f32 to vector<128x128xf32>
    %19 = arith.select %17, %15, %18 : vector<128x128xi1>, vector<128x128xf32>
    %20 = arith.truncf %19 : vector<128x128xf32> to vector<128x128xbf16>
    %c1 = arith.constant 1 : index
    %c0_12 = arith.constant 0 : index
    %c0_13 = arith.constant 0 : index
    %21 = vector.load %arg2[%c1, %c0_12, %c0_13] : memref<7x128x128xbf16, #tpu.memory_space<vmem>>, vector<1x128x128xbf16>
    %22 = vector.shape_cast %21 : vector<1x128x128xbf16> to vector<128x128xbf16>
    %cst_14 = arith.constant dense<0.000000e+00> : vector<128x128xf32>
    %23 = tpu.matmul %20, %22, %cst_14 {dimension_numbers = #tpu.dot_dimension_numbers<[1], [0], [0], [1], [0, 0, 1, 1], [], []>} : vector<128x128xbf16>, vector<128x128xbf16>, vector<128x128xf32> -> vector<128x128xf32>
    %24 = arith.truncf %23 : vector<128x128xf32> to vector<128x128xbf16>
    %cst_15 = arith.constant dense<0.000000e+00> : vector<128x128xf32>
    %25 = tpu.matmul %0, %24, %cst_15 {dimension_numbers = #tpu.dot_dimension_numbers<[1], [0], [0], [1], [0, 0, 1, 1], [], []>} : vector<128x128xbf16>, vector<128x128xbf16>, vector<128x128xf32> -> vector<128x128xf32>
    %c1_16 = arith.constant 1 : index
    %c0_17 = arith.constant 0 : index
    %c0_18 = arith.constant 0 : index
    %26 = vector.load %arg3[%c1_16, %c0_17, %c0_18] : memref<7x1x128xf32, #tpu.memory_space<vmem>>, vector<1x1x128xf32>
    %27 = vector.shape_cast %26 : vector<1x1x128xf32> to vector<1x128xf32>
    %28 = vector.broadcast %27 : vector<1x128xf32> to vector<128x128xf32>
    %29 = arith.addf %25, %28 : vector<128x128xf32>
    %cst_19 = arith.constant 0.000000e+00 : f32
    %30 = vector.broadcast %cst_19 : f32 to vector<128x128xf32>
    %31 = arith.maximumf %29, %30 : vector<128x128xf32>
    %cst_20 = arith.constant 0.000000e+00 : f32
    %32 = vector.shape_cast %4 : vector<128x1xi1> to vector<128x1xi1>
    %33 = vector.broadcast %32 : vector<128x1xi1> to vector<128x128xi1>
    %34 = vector.broadcast %cst_20 : f32 to vector<128x128xf32>
    %35 = arith.select %33, %31, %34 : vector<128x128xi1>, vector<128x128xf32>
    %36 = arith.truncf %35 : vector<128x128xf32> to vector<128x128xbf16>
    %c2 = arith.constant 2 : index
    %c0_21 = arith.constant 0 : index
    %c0_22 = arith.constant 0 : index
    %37 = vector.load %arg2[%c2, %c0_21, %c0_22] : memref<7x128x128xbf16, #tpu.memory_space<vmem>>, vector<1x128x128xbf16>
    %38 = vector.shape_cast %37 : vector<1x128x128xbf16> to vector<128x128xbf16>
    %cst_23 = arith.constant dense<0.000000e+00> : vector<128x128xf32>
    %39 = tpu.matmul %36, %38, %cst_23 {dimension_numbers = #tpu.dot_dimension_numbers<[1], [0], [0], [1], [0, 0, 1, 1], [], []>} : vector<128x128xbf16>, vector<128x128xbf16>, vector<128x128xf32> -> vector<128x128xf32>
    %40 = arith.truncf %39 : vector<128x128xf32> to vector<128x128xbf16>
    %cst_24 = arith.constant dense<0.000000e+00> : vector<128x128xf32>
    %41 = tpu.matmul %0, %40, %cst_24 {dimension_numbers = #tpu.dot_dimension_numbers<[1], [0], [0], [1], [0, 0, 1, 1], [], []>} : vector<128x128xbf16>, vector<128x128xbf16>, vector<128x128xf32> -> vector<128x128xf32>
    %c2_25 = arith.constant 2 : index
    %c0_26 = arith.constant 0 : index
    %c0_27 = arith.constant 0 : index
    %42 = vector.load %arg3[%c2_25, %c0_26, %c0_27] : memref<7x1x128xf32, #tpu.memory_space<vmem>>, vector<1x1x128xf32>
    %43 = vector.shape_cast %42 : vector<1x1x128xf32> to vector<1x128xf32>
    %44 = vector.broadcast %43 : vector<1x128xf32> to vector<128x128xf32>
    %45 = arith.addf %41, %44 : vector<128x128xf32>
    %cst_28 = arith.constant 0.000000e+00 : f32
    %46 = vector.broadcast %cst_28 : f32 to vector<128x128xf32>
    %47 = arith.maximumf %45, %46 : vector<128x128xf32>
    %cst_29 = arith.constant 0.000000e+00 : f32
    %48 = vector.shape_cast %4 : vector<128x1xi1> to vector<128x1xi1>
    %49 = vector.broadcast %48 : vector<128x1xi1> to vector<128x128xi1>
    %50 = vector.broadcast %cst_29 : f32 to vector<128x128xf32>
    %51 = arith.select %49, %47, %50 : vector<128x128xi1>, vector<128x128xf32>
    %52 = arith.truncf %51 : vector<128x128xf32> to vector<128x128xbf16>
    %c3 = arith.constant 3 : index
    %c0_30 = arith.constant 0 : index
    %c0_31 = arith.constant 0 : index
    %53 = vector.load %arg2[%c3, %c0_30, %c0_31] : memref<7x128x128xbf16, #tpu.memory_space<vmem>>, vector<1x128x128xbf16>
    %54 = vector.shape_cast %53 : vector<1x128x128xbf16> to vector<128x128xbf16>
    %cst_32 = arith.constant dense<0.000000e+00> : vector<128x128xf32>
    %55 = tpu.matmul %52, %54, %cst_32 {dimension_numbers = #tpu.dot_dimension_numbers<[1], [0], [0], [1], [0, 0, 1, 1], [], []>} : vector<128x128xbf16>, vector<128x128xbf16>, vector<128x128xf32> -> vector<128x128xf32>
    %56 = arith.truncf %55 : vector<128x128xf32> to vector<128x128xbf16>
    %cst_33 = arith.constant dense<0.000000e+00> : vector<128x128xf32>
    %57 = tpu.matmul %0, %56, %cst_33 {dimension_numbers = #tpu.dot_dimension_numbers<[1], [0], [0], [1], [0, 0, 1, 1], [], []>} : vector<128x128xbf16>, vector<128x128xbf16>, vector<128x128xf32> -> vector<128x128xf32>
    %c3_34 = arith.constant 3 : index
    %c0_35 = arith.constant 0 : index
    %c0_36 = arith.constant 0 : index
    %58 = vector.load %arg3[%c3_34, %c0_35, %c0_36] : memref<7x1x128xf32, #tpu.memory_space<vmem>>, vector<1x1x128xf32>
    %59 = vector.shape_cast %58 : vector<1x1x128xf32> to vector<1x128xf32>
    %60 = vector.broadcast %59 : vector<1x128xf32> to vector<128x128xf32>
    %61 = arith.addf %57, %60 : vector<128x128xf32>
    %cst_37 = arith.constant 0.000000e+00 : f32
    %62 = vector.broadcast %cst_37 : f32 to vector<128x128xf32>
    %63 = arith.maximumf %61, %62 : vector<128x128xf32>
    %cst_38 = arith.constant 0.000000e+00 : f32
    %64 = vector.shape_cast %4 : vector<128x1xi1> to vector<128x1xi1>
    %65 = vector.broadcast %64 : vector<128x1xi1> to vector<128x128xi1>
    %66 = vector.broadcast %cst_38 : f32 to vector<128x128xf32>
    %67 = arith.select %65, %63, %66 : vector<128x128xi1>, vector<128x128xf32>
    %68 = arith.truncf %67 : vector<128x128xf32> to vector<128x128xbf16>
    %c4 = arith.constant 4 : index
    %c0_39 = arith.constant 0 : index
    %c0_40 = arith.constant 0 : index
    %69 = vector.load %arg2[%c4, %c0_39, %c0_40] : memref<7x128x128xbf16, #tpu.memory_space<vmem>>, vector<1x128x128xbf16>
    %70 = vector.shape_cast %69 : vector<1x128x128xbf16> to vector<128x128xbf16>
    %cst_41 = arith.constant dense<0.000000e+00> : vector<128x128xf32>
    %71 = tpu.matmul %68, %70, %cst_41 {dimension_numbers = #tpu.dot_dimension_numbers<[1], [0], [0], [1], [0, 0, 1, 1], [], []>} : vector<128x128xbf16>, vector<128x128xbf16>, vector<128x128xf32> -> vector<128x128xf32>
    %72 = arith.truncf %71 : vector<128x128xf32> to vector<128x128xbf16>
    %cst_42 = arith.constant dense<0.000000e+00> : vector<128x128xf32>
    %73 = tpu.matmul %0, %72, %cst_42 {dimension_numbers = #tpu.dot_dimension_numbers<[1], [0], [0], [1], [0, 0, 1, 1], [], []>} : vector<128x128xbf16>, vector<128x128xbf16>, vector<128x128xf32> -> vector<128x128xf32>
    %c4_43 = arith.constant 4 : index
    %c0_44 = arith.constant 0 : index
    %c0_45 = arith.constant 0 : index
    %74 = vector.load %arg3[%c4_43, %c0_44, %c0_45] : memref<7x1x128xf32, #tpu.memory_space<vmem>>, vector<1x1x128xf32>
    %75 = vector.shape_cast %74 : vector<1x1x128xf32> to vector<1x128xf32>
    %76 = vector.broadcast %75 : vector<1x128xf32> to vector<128x128xf32>
    %77 = arith.addf %73, %76 : vector<128x128xf32>
    %cst_46 = arith.constant 0.000000e+00 : f32
    %78 = vector.broadcast %cst_46 : f32 to vector<128x128xf32>
    %79 = arith.maximumf %77, %78 : vector<128x128xf32>
    %cst_47 = arith.constant 0.000000e+00 : f32
    %80 = vector.shape_cast %4 : vector<128x1xi1> to vector<128x1xi1>
    %81 = vector.broadcast %80 : vector<128x1xi1> to vector<128x128xi1>
    %82 = vector.broadcast %cst_47 : f32 to vector<128x128xf32>
    %83 = arith.select %81, %79, %82 : vector<128x128xi1>, vector<128x128xf32>
    %84 = arith.truncf %83 : vector<128x128xf32> to vector<128x128xbf16>
    %c5 = arith.constant 5 : index
    %c0_48 = arith.constant 0 : index
    %c0_49 = arith.constant 0 : index
    %85 = vector.load %arg2[%c5, %c0_48, %c0_49] : memref<7x128x128xbf16, #tpu.memory_space<vmem>>, vector<1x128x128xbf16>
    %86 = vector.shape_cast %85 : vector<1x128x128xbf16> to vector<128x128xbf16>
    %cst_50 = arith.constant dense<0.000000e+00> : vector<128x128xf32>
    %87 = tpu.matmul %84, %86, %cst_50 {dimension_numbers = #tpu.dot_dimension_numbers<[1], [0], [0], [1], [0, 0, 1, 1], [], []>} : vector<128x128xbf16>, vector<128x128xbf16>, vector<128x128xf32> -> vector<128x128xf32>
    %88 = arith.truncf %87 : vector<128x128xf32> to vector<128x128xbf16>
    %cst_51 = arith.constant dense<0.000000e+00> : vector<128x128xf32>
    %89 = tpu.matmul %0, %88, %cst_51 {dimension_numbers = #tpu.dot_dimension_numbers<[1], [0], [0], [1], [0, 0, 1, 1], [], []>} : vector<128x128xbf16>, vector<128x128xbf16>, vector<128x128xf32> -> vector<128x128xf32>
    %c5_52 = arith.constant 5 : index
    %c0_53 = arith.constant 0 : index
    %c0_54 = arith.constant 0 : index
    %90 = vector.load %arg3[%c5_52, %c0_53, %c0_54] : memref<7x1x128xf32, #tpu.memory_space<vmem>>, vector<1x1x128xf32>
    %91 = vector.shape_cast %90 : vector<1x1x128xf32> to vector<1x128xf32>
    %92 = vector.broadcast %91 : vector<1x128xf32> to vector<128x128xf32>
    %93 = arith.addf %89, %92 : vector<128x128xf32>
    %cst_55 = arith.constant 0.000000e+00 : f32
    %94 = vector.broadcast %cst_55 : f32 to vector<128x128xf32>
    %95 = arith.maximumf %93, %94 : vector<128x128xf32>
    %cst_56 = arith.constant 0.000000e+00 : f32
    %96 = vector.shape_cast %4 : vector<128x1xi1> to vector<128x1xi1>
    %97 = vector.broadcast %96 : vector<128x1xi1> to vector<128x128xi1>
    %98 = vector.broadcast %cst_56 : f32 to vector<128x128xf32>
    %99 = arith.select %97, %95, %98 : vector<128x128xi1>, vector<128x128xf32>
    %100 = arith.truncf %99 : vector<128x128xf32> to vector<128x128xbf16>
    %c128 = arith.constant 128 : index
    %c0_57 = arith.constant 0 : index
    %101 = vector.load %arg0[%c128, %c0_57] : memref<136x128xbf16, #tpu.memory_space<vmem>>, vector<8x128xbf16>
    %cst_58 = arith.constant dense<0.000000e+00> : vector<8x128xf32>
    %102 = tpu.matmul %101, %100, %cst_58 {dimension_numbers = #tpu.dot_dimension_numbers<[1], [0], [0], [1], [0, 0, 1, 1], [], []>} : vector<8x128xbf16>, vector<128x128xbf16>, vector<8x128xf32> -> vector<8x128xf32>
    %103 = arith.truncf %102 : vector<8x128xf32> to vector<8x128xbf16>
    %c6 = arith.constant 6 : index
    %c0_59 = arith.constant 0 : index
    %c0_60 = arith.constant 0 : index
    %104 = vector.load %arg2[%c6, %c0_59, %c0_60] : memref<7x128x128xbf16, #tpu.memory_space<vmem>>, vector<1x128x128xbf16>
    %105 = vector.shape_cast %104 : vector<1x128x128xbf16> to vector<128x128xbf16>
    %cst_61 = arith.constant dense<0.000000e+00> : vector<8x128xf32>
    %106 = tpu.matmul %103, %105, %cst_61 {dimension_numbers = #tpu.dot_dimension_numbers<[1], [0], [0], [1], [0, 0, 1, 1], [], []>} : vector<8x128xbf16>, vector<128x128xbf16>, vector<8x128xf32> -> vector<8x128xf32>
    %c6_62 = arith.constant 6 : index
    %c0_63 = arith.constant 0 : index
    %c0_64 = arith.constant 0 : index
    %107 = vector.load %arg3[%c6_62, %c0_63, %c0_64] : memref<7x1x128xf32, #tpu.memory_space<vmem>>, vector<1x1x128xf32>
    %108 = vector.shape_cast %107 : vector<1x1x128xf32> to vector<1x128xf32>
    %109 = vector.broadcast %108 : vector<1x128xf32> to vector<8x128xf32>
    %110 = arith.addf %106, %109 : vector<8x128xf32>
    %c0_65 = arith.constant 0 : index
    %c0_66 = arith.constant 0 : index
    %111 = vector.load %arg4[%c0_65, %c0_66] : memref<8x128xf32, #tpu.memory_space<vmem>>, vector<8x128xf32>
    tpu.vector_store %arg4[%c0_65, %c0_66], %110 {strides = array<i32>} : memref<8x128xf32, #tpu.memory_space<vmem>>, vector<8x128xf32>,
    return
  }
}

</mosaic_0001>

<bundles_post_ra>
// kernel: fwd.1
= control target key start
LH: loop header
LB: loop body
LE: loop exit
PB: predicated region body
PF: predicated region fallthrough
CT: control target
= control target key end

     0   :  { %9 = vsyncpa [#allocation3], 0  ;;  %s3404_s0 = inlined_call_operand.hbm [shape: bf16[136,128], index: 0, kind: input, shape index: {}]   ;;  %s3405_s1 = inlined_call_operand.hbm [shape: bf16[128,128], index: 1, kind: input, shape index: {}]   ;;  %s3406_s2 = inlined_call_operand.hbm [shape: bf16[7,128,128], index: 2, kind: input, shape index: {}]   ;;  %s3407_s3 = inlined_call_operand.vmem [shape: f32[7,1,128], index: 3, kind: input, shape index: {}]   ;;  %s3408_s4 = inlined_call_operand.hbm [shape: f32[8,128], index: 4, kind: output, shape index: {}]  }
   0x1   :  { %10 = vsyncpa [#allocation6], 0 }
   0x2   :  { %11 = vsyncpa [#allocation4], 0  ;;  %s3186_s15 = smov [#allocation5]   ;;  %s3187_s17 = smov [#allocation2]  }
   0x3   :  { %s29_s16 = sshll.u32 %s3186_s15, 4  ;;  %s17_s18 = sshll.u32 %s3187_s17, 4  ;;  %s30_s16 = int_to_ptr.vmem [resolvable:$true] %s29_s16  ;;  %s3220_s18 = int_to_ptr.vmem [resolvable:$true] %s17_s18 }
   0x4   :  { %s3092_s21 = scalar_lea.hbm %s3405_s1, 1024 }
   0x5   :  { %p3093_p0 = scmp.ne.s32.totalorder %s3405_s1, %s3092_s21  ;;  %p3096_p1 = scmp.lt.u32.totalorder %s3092_s21, %s3405_s1 }
   0x7   :  { %p3098_p2 = pnand %p3096_p1, %p3093_p0 }
   0x9   :  { %3101 = shalt.err (!%p3098_p2)
}
   0xa   :  { %s3102_s26 = scalar_lea.vmem %s30_s16, 1024  ;;  %p3107_p4 = scmp.lt.s32.totalorder %s30_s16, %s30_s16 }
   0xb   :  { %p3103_p3 = scmp.ne.s32.totalorder %s30_s16, %s3102_s26  ;;  %p3108_p5 = scmp.lt.s32.totalorder %s3102_s26, %s3102_s26 }
   0xd   :  { %p3109_p6 = por %p3108_p5, %p3107_p4 }
   0xf   :  { %p3110_p7 = pnand %p3109_p6, %p3103_p3 }
  0x11   :  { %3113 = shalt.err (!%p3110_p7)
}
  0x12   :  { %s3188_s27 = smov 64   ;;  %s3189_s28 = smov 4  }
  0x13   :  { %35 = dma.hbm_to_vmem [thread:$0]  %s3405_s1, 1024, %s30_s16, [#allocation6], %s3188_s27, %s3188_s27, %s3189_s28  }
  0x14   :  { %s3114_s7 = scalar_lea.hbm %s3404_s0, 1088 }
  0x15   :  { %p3115_p8 = scmp.ne.s32.totalorder %s3404_s0, %s3114_s7  ;;  %p3118_p9 = scmp.lt.u32.totalorder %s3114_s7, %s3404_s0 }
  0x17   :  { %p3120_p10 = pnand %p3118_p9, %p3115_p8 }
  0x19   :  { %3123 = shalt.err (!%p3120_p10)
}
  0x1a   :  { %s3124_s12 = scalar_lea.vmem %s3220_s18, 1088  ;;  %p3129_p12 = scmp.lt.s32.totalorder %s3220_s18, %s3220_s18 }
  0x1b   :  { %p3125_p11 = scmp.ne.s32.totalorder %s3220_s18, %s3124_s12  ;;  %p3130_p13 = scmp.lt.s32.totalorder %s3124_s12, %s3124_s12 }
  0x1d   :  { %p3131_p0 = por %p3130_p13, %p3129_p12 }
  0x1f   :  { %p3132_p1 = pnand %p3131_p0, %p3125_p11 }
  0x21   :  { %3135 = shalt.err (!%p3132_p1)
}
  0x22   :  { %23 = dma.hbm_to_vmem [thread:$0]  %s3404_s0, 1088, %s3220_s18, [#allocation3], %s3188_s27, %s3188_s27, %s3189_s28  }
  0x23   :  { %s3190_s14 = smov [#allocation7]   ;;  %s3136_s19 = scalar_lea.hbm %s3406_s2, 7168 }
  0x24   :  { %s41_s15 = sshll.u32 %s3190_s14, 4  ;;  %p3137_p2 = scmp.ne.s32.totalorder %s3406_s2, %s3136_s19  ;;  %s42_s15 = int_to_ptr.vmem [resolvable:$true] %s41_s15 }
  0x25   :  { %p3140_p3 = scmp.lt.u32.totalorder %s3136_s19, %s3406_s2 }
  0x27   :  { %p3142_p4 = pnand %p3140_p3, %p3137_p2 }
  0x29   :  { %3145 = shalt.err (!%p3142_p4)
}
  0x2a   :  { %s3146_s24 = scalar_lea.vmem %s42_s15, 7168  ;;  %p3151_p6 = scmp.lt.s32.totalorder %s42_s15, %s42_s15 }
  0x2b   :  { %p3147_p5 = scmp.ne.s32.totalorder %s42_s15, %s3146_s24  ;;  %p3152_p7 = scmp.lt.s32.totalorder %s3146_s24, %s3146_s24 }
  0x2d   :  { %p3153_p8 = por %p3152_p7, %p3151_p6 }
  0x2f   :  { %p3154_p9 = pnand %p3153_p8, %p3147_p5 }
  0x31   :  { %3157 = shalt.err (!%p3154_p9)
}
  0x32   :  { %47 = dma.hbm_to_vmem [thread:$0]  %s3406_s2, 7168, %s42_s15, [#allocation6], %s3188_s27, %s3188_s27, %s3189_s28  }
  0x33   :  { %3180 = dma.done.wait [#allocation3], 1088  }
  0x34   :  { %3181 = vsyncadd [#allocation3], 4294966208 }
  0x35   :  { %3182 = dma.done.wait [#allocation6], 8192  }
  0x36   :  { %3183 = vsyncadd [#allocation6], 4294959104  ;;  %v3020_v0 = vld [vmem:[#allocation7] sm:$0xff]   ;;  %v3021_v1 = vld [vmem:[#allocation7 + $0x8] sm:$0xff]   ;;  %v3191_v60 = vmov 0.0|0.0   ;;  %vm3193_vm0 = vmmov 0  }
  0x37   :  { %2601 = vmatprep.subr.bf16.mxu0 %v3020_v0  ;;  %v3022_v2 = vld [vmem:[#allocation7 + $0x10] sm:$0xff]   ;;  %v3023_v3 = vld [vmem:[#allocation7 + $0x18] sm:$0xff]   ;;  %v3028_v4 = vld [vmem:[#allocation5] sm:$0xff]   ;;  %s3194_s12 = smov [#allocation8]  }
  0x38   :  { %2602 = vmatpush3.bf16.msra.mxu0 %v3020_v0  ;;  %2617 = vmatprep.mubr.bf16.mxu0 %v3028_v4  ;;  %v3024_v5 = vld [vmem:[#allocation7 + $0x20] sm:$0xff]   ;;  %v3025_v6 = vld [vmem:[#allocation7 + $0x28] sm:$0xff]   ;;  %v3026_v7 = vld [vmem:[#allocation7 + $0x30] sm:$0xff]   ;;  %s2303_s1 = sshll.u32 %s3194_s12, 4  ;;  %s2304_s1 = int_to_ptr.vmem [resolvable:$true] %s2303_s1 }
  0x39   :  { %2603 = vmatprep.subr.bf16.mxu0 %v3021_v1  ;;  %v3027_v8 = vld [vmem:[#allocation7 + $0x38] sm:$0xff]   ;;  %v3029_v9 = vld [vmem:[#allocation5 + $0x8] sm:$0xff]   ;;  %v3030_v10 = vld [vmem:[#allocation5 + $0x10] sm:$0xff]   ;;  %s3158_s13 = scalar_lea.vmem %s2304_s1, 128  ;;  %p3163_p11 = scmp.lt.s32.totalorder %s2304_s1, %s2304_s1 }
  0x3a   :  { %v3031_v11 = vld [vmem:[#allocation5 + $0x18] sm:$0xff]   ;;  %v3032_v12 = vld [vmem:[#allocation5 + $0x20] sm:$0xff]   ;;  %v3033_v13 = vld [vmem:[#allocation5 + $0x28] sm:$0xff]   ;;  %p3159_p10 = scmp.ne.s32.totalorder %s2304_s1, %s3158_s13  ;;  %p3164_p12 = scmp.lt.s32.totalorder %s3158_s13, %s3158_s13 }
  0x3b   :  { %v3034_v14 = vld [vmem:[#allocation5 + $0x30] sm:$0xff]   ;;  %v3035_v15 = vld [vmem:[#allocation5 + $0x38] sm:$0xff]   ;;  %v3038_v17 = vld [vmem:[#allocation7 + $0x40] sm:$0xff]  }
  0x3c   :  { %2604 = vmatpush3.bf16.msra.mxu0 %v3021_v1  ;;  %v3272_v16 = vld [vmem:[#allocation2] sm:$0xff]   ;;  %v3039_v18 = vld [vmem:[#allocation7 + $0x48] sm:$0xff]   ;;  %v3040_v19 = vld [vmem:[#allocation7 + $0x50] sm:$0xff]   ;;  %p3165_p13 = por %p3164_p12, %p3163_p11 }
  0x3d   :  { %2605 = vmatprep.subr.bf16.mxu0 %v3022_v2  ;;  %2649 = vmatprep.mubr.bf16.mxu1 %v3272_v16  ;;  %v3041_v20 = vld [vmem:[#allocation7 + $0x58] sm:$0xff]   ;;  %v3042_v21 = vld [vmem:[#allocation7 + $0x60] sm:$0xff]   ;;  %v3043_v22 = vld [vmem:[#allocation7 + $0x68] sm:$0xff]  }
  0x3e   :  { %v3275_v47 = vld [vmem:[#allocation2 + $0x8] sm:$0xff]   ;;  %v3044_v48 = vld [vmem:[#allocation7 + $0x70] sm:$0xff]   ;;  %v3045_v49 = vld [vmem:[#allocation7 + $0x78] sm:$0xff]   ;;  %p3166_p0 = pnand %p3165_p13, %p3159_p10 }
  0x3f   :  { %v2329_v50 = vld [vmem:[%s3407_s3] ss:$0 sm:$0xff]  ;;  %v3288_v61 = vld [vmem:[#allocation2 + $0x10] sm:$0xff]   ;;  %v3290_v62 = vld [vmem:[#allocation2 + $0x18] sm:$0xff]  }
  0x40   :  { %2606 = vmatpush3.bf16.msra.mxu0 %v3022_v2  ;;  %v3294_v63 = vld [vmem:[#allocation2 + $0x20] sm:$0xff]   ;;  %v3296_v0 = vld [vmem:[#allocation2 + $0x28] sm:$0xff]   ;;  %v3300_v1 = vld [vmem:[#allocation2 + $0x30] sm:$0xff]  }
  0x41   :  { %2607 = vmatprep.subr.bf16.mxu0 %v3023_v3  ;;  %v3302_v2 = vld [vmem:[#allocation2 + $0x38] sm:$0xff]   ;;  %v3053_v4 = vld [vmem:[#allocation7 + $0x88] sm:$0xff]  }
  0x44   :  { %2608 = vmatpush3.bf16.msra.mxu0 %v3023_v3  ;;  %v3052_v3 = vld [vmem:[#allocation7 + $0x80] sm:$0xff]  }
  0x45   :  { %2609 = vmatprep.subr.bf16.mxu0 %v3024_v5 }
  0x48   :  { %2610 = vmatpush3.bf16.msra.mxu0 %v3024_v5  ;;  %v3054_v5 = vld [vmem:[#allocation7 + $0x90] sm:$0xff]  }
  0x49   :  { %2611 = vmatprep.subr.bf16.mxu0 %v3025_v6 }
  0x4c   :  { %2612 = vmatpush3.bf16.msra.mxu0 %v3025_v6  ;;  %v3055_v6 = vld [vmem:[#allocation7 + $0x98] sm:$0xff]  }
  0x4d   :  { %2613 = vmatprep.subr.bf16.mxu0 %v3026_v7 }
  0x50   :  { %2614 = vmatpush3.bf16.msra.mxu0 %v3026_v7  ;;  %v3056_v7 = vld [vmem:[#allocation7 + $0xa0] sm:$0xff]  }
  0x51   :  { %2615 = vmatprep.subr.bf16.mxu0 %v3027_v8 }
  0x54   :  { %2616 = vmatpush3.bf16.msra.mxu0 %v3027_v8  ;;  %v3057_v8 = vld [vmem:[#allocation7 + $0xa8] sm:$0xff]  }
  0x55   :  { %2665 = vmatprep.subr.bf16.mxu0 %v3038_v17 }
  0x57   :  { %2618 = vmatmul.mubr.bf16.vlgmr.msra.gmra.mrb[0].mxu0 %v3029_v9 }
  0x58   :  { %2621 = vmatprep.mubr.bf16.mxu0 %v3030_v10  ;;  %2666 = vmatpush3.bf16.msra.mxu0 %v3038_v17 }
  0x59   :  { %2667 = vmatprep.subr.bf16.mxu0 %v3039_v18 }
  0x5c   :  { %2668 = vmatpush3.bf16.msra.mxu0 %v3039_v18 }
  0x5d   :  { %2669 = vmatprep.subr.bf16.mxu0 %v3040_v19 }
  0x5f   :  { %2622 = vmatmul.mubr.bf16.gmra.mrb[4].mxu0 %v3031_v11 }
  0x60   :  { %2625 = vmatprep.mubr.bf16.mxu0 %v3032_v12  ;;  %2670 = vmatpush3.bf16.msra.mxu0 %v3040_v19 }
  0x61   :  { %2671 = vmatprep.subr.bf16.mxu0 %v3041_v20 }
  0x64   :  { %2672 = vmatpush3.bf16.msra.mxu0 %v3041_v20 }
  0x65   :  { %2673 = vmatprep.subr.bf16.mxu0 %v3042_v21 }
  0x67   :  { %2626 = vmatmul.mubr.bf16.gmra.mrb[8].mxu0 %v3033_v13 }
  0x68   :  { %2629 = vmatprep.mubr.bf16.mxu0 %v3034_v14  ;;  %2674 = vmatpush3.bf16.msra.mxu0 %v3042_v21 }
  0x69   :  { %2675 = vmatprep.subr.bf16.mxu0 %v3043_v22 }
  0x6c   :  { %2676 = vmatpush3.bf16.msra.mxu0 %v3043_v22 }
  0x6d   :  { %2677 = vmatprep.subr.bf16.mxu0 %v3044_v48 }
  0x6f   :  { %2630 = vmatmul.mubr.bf16.gmra.mrb[12].mxu0 %v3035_v15 }
  0x70   :  { %2678 = vmatpush3.bf16.msra.mxu0 %v3044_v48  ;;  %v3059_v48 = vld [vmem:[#allocation7 + $0xb8] sm:$0xff]  }
  0x71   :  { %2679 = vmatprep.subr.bf16.mxu0 %v3045_v49 }
  0x74   :  { %2680 = vmatpush3.bf16.msra.mxu0 %v3045_v49  ;;  %v2347_v49 = vld [vmem:[%s3407_s3 + $0x1] ss:$0 sm:$0xff] }
  0x75   :  { %2729 = vmatprep.subr.bf16.mxu0 %v3052_v3 }
 0x12a   :  { %v2619_v23 = vpop.f32.mrb[0].mxu0 }
 0x12b   :  { %v271_v24 = vpop.f32.mrb[1].mxu0 }
 0x12c   :  { %v2620_v25 = vpop.f32.mrb[2].mxu0 }
 0x12d   :  { %v335_v26 = vpack.c.bf16 %v2620_v25, %v2619_v23  ;;  %v274_v27 = vpop.f32.mrb[3].mxu0 }
 0x12e   :  { %v334_v28 = vpack.c.bf16 %v274_v27, %v271_v24 }
 0x130   :  { %2633 = vmatprep.subr.bf16.mxu1 %v334_v28 }
 0x131   :  { %2634 = vmatpush3.bf16.msra.mxu1 %v334_v28 }
 0x132   :  { %v2623_v29 = vpop.f32.mrb[4].mxu0  ;;  %2635 = vmatprep.subr.bf16.mxu1 %v335_v26 }
 0x133   :  { %v287_v30 = vpop.f32.mrb[5].mxu0 }
 0x134   :  { %v2624_v31 = vpop.f32.mrb[6].mxu0 }
 0x135   :  { %v337_v32 = vpack.c.bf16 %v2624_v31, %v2623_v29  ;;  %v290_v33 = vpop.f32.mrb[7].mxu0  ;;  %2636 = vmatpush3.bf16.msra.mxu1 %v335_v26 }
 0x136   :  { %v336_v34 = vpack.c.bf16 %v290_v33, %v287_v30 }
 0x138   :  { %2637 = vmatprep.subr.bf16.mxu1 %v336_v34 }
 0x139   :  { %2638 = vmatpush3.bf16.msra.mxu1 %v336_v34 }
 0x13a   :  { %v2627_v35 = vpop.f32.mrb[8].mxu0  ;;  %2639 = vmatprep.subr.bf16.mxu1 %v337_v32 }
 0x13b   :  { %v303_v36 = vpop.f32.mrb[9].mxu0 }
 0x13c   :  { %v2628_v37 = vpop.f32.mrb[10].mxu0 }
 0x13d   :  { %v339_v38 = vpack.c.bf16 %v2628_v37, %v2627_v35  ;;  %v306_v39 = vpop.f32.mrb[11].mxu0  ;;  %2640 = vmatpush3.bf16.msra.mxu1 %v337_v32 }
 0x13e   :  { %v338_v40 = vpack.c.bf16 %v306_v39, %v303_v36 }
 0x140   :  { %2641 = vmatprep.subr.bf16.mxu1 %v338_v40 }
 0x141   :  { %2642 = vmatpush3.bf16.msra.mxu1 %v338_v40 }
 0x142   :  { %v2631_v41 = vpop.f32.mrb[12].mxu0  ;;  %2643 = vmatprep.subr.bf16.mxu1 %v339_v38 }
 0x143   :  { %v319_v42 = vpop.f32.mrb[13].mxu0 }
 0x144   :  { %v2632_v43 = vpop.f32.mrb[14].mxu0 }
 0x145   :  { %v341_v44 = vpack.c.bf16 %v2632_v43, %v2631_v41  ;;  %v322_v45 = vpop.f32.mrb[15].mxu0  ;;  %2644 = vmatpush3.bf16.msra.mxu1 %v339_v38 }
 0x146   :  { %v340_v46 = vpack.c.bf16 %v322_v45, %v319_v42 }
 0x148   :  { %2645 = vmatprep.subr.bf16.mxu1 %v340_v46 }
 0x149   :  { %2646 = vmatpush3.bf16.msra.mxu1 %v340_v46  ;;  %v3058_v46 = vld [vmem:[#allocation7 + $0xb0] sm:$0xff]  }
 0x14a   :  { %2647 = vmatprep.subr.bf16.mxu1 %v341_v44 }
 0x14d   :  { %2648 = vmatpush3.bf16.msra.mxu1 %v341_v44 }
 0x150   :  { %2650 = vmatmul.mubr.bf16.vlgmr.msra.gmra.mrb[0].mxu1 %v3275_v47 }
 0x151   :  { %2653 = vmatprep.mubr.bf16.mxu1 %v3288_v61 }
 0x158   :  { %2654 = vmatmul.mubr.bf16.gmra.mrb[4].mxu1 %v3290_v62 }
 0x159   :  { %2657 = vmatprep.mubr.bf16.mxu1 %v3294_v63 }
 0x160   :  { %2658 = vmatmul.mubr.bf16.gmra.mrb[8].mxu1 %v3296_v0 }
 0x161   :  { %2661 = vmatprep.mubr.bf16.mxu1 %v3300_v1 }
 0x168   :  { %2662 = vmatmul.mubr.bf16.gmra.mrb[12].mxu1 %v3302_v2 }
 0x169   :  { %2713 = vmatprep.mubr.bf16.mxu1 %v3272_v16 }
 0x223   :  { %v2651_v51 = vpop.f32.mrb[0].mxu1 }
 0x224   :  { %v431_v52 = vpop.f32.mrb[1].mxu1 }
 0x225   :  { %v432_v53 = vadd.f32 %v2329_v50, %v431_v52  ;;  %v2652_v54 = vpop.f32.mrb[2].mxu1 }
 0x226   :  { %v434_v55 = vpop.f32.mrb[3].mxu1 }
 0x227   :  { %v435_v56 = vadd.f32 %v2329_v50, %v434_v55  ;;  %v494_v57 = vmax.f32 %v432_v53, 0.0 }
 0x229   :  { %v495_v58 = vmax.f32 %v435_v56, 0.0 }
 0x22b   :  { %v558_v59 = vpack.c.bf16 %v495_v58, %v494_v57  ;;  %v2655_v34 = vpop.f32.mrb[4].mxu1 }
 0x22c   :  { %v447_v35 = vpop.f32.mrb[5].mxu1 }
 0x22d   :  { %2681 = vmatprep.mubr.bf16.mxu0 %v558_v59  ;;  %v2656_v36 = vpop.f32.mrb[6].mxu1 }
 0x22e   :  { %2682 = vmatmul.mubr.bf16.vlgmr.msra.gmra.mrb[16].mxu0 %v3191_v60  ;;  %v450_v37 = vpop.f32.mrb[7].mxu1 }
 0x22f   :  { %2685 = vmatprep.mubr.bf16.mxu0 %v3191_v60  ;;  %2730 = vmatpush3.bf16.msra.mxu0 %v3052_v3 }
 0x230   :  { %2731 = vmatprep.subr.bf16.mxu0 %v3053_v4 }
 0x233   :  { %2732 = vmatpush3.bf16.msra.mxu0 %v3053_v4  ;;  %v2659_v38 = vpop.f32.mrb[8].mxu1 }
 0x234   :  { %2733 = vmatprep.subr.bf16.mxu0 %v3054_v5  ;;  %v463_v39 = vpop.f32.mrb[9].mxu1 }
 0x235   :  { %v2660_v40 = vpop.f32.mrb[10].mxu1 }
 0x236   :  { %2686 = vmatmul.mubr.bf16.gmra.mrb[20].mxu0 %v3191_v60  ;;  %v466_v41 = vpop.f32.mrb[11].mxu1 }
 0x237   :  { %2689 = vmatprep.mubr.bf16.mxu0 %v3191_v60  ;;  %2734 = vmatpush3.bf16.msra.mxu0 %v3054_v5 }
 0x238   :  { %2735 = vmatprep.subr.bf16.mxu0 %v3055_v6 }
 0x23b   :  { %2736 = vmatpush3.bf16.msra.mxu0 %v3055_v6  ;;  %v2663_v42 = vpop.f32.mrb[12].mxu1 }
 0x23c   :  { %2737 = vmatprep.subr.bf16.mxu0 %v3056_v7  ;;  %v479_v43 = vpop.f32.mrb[13].mxu1 }
 0x23d   :  { %v2664_v44 = vpop.f32.mrb[14].mxu1 }
 0x23e   :  { %2690 = vmatmul.mubr.bf16.gmra.mrb[24].mxu0 %v3191_v60  ;;  %v482_v45 = vpop.f32.mrb[15].mxu1 }
 0x23f   :  { %2693 = vmatprep.mubr.bf16.mxu0 %v3191_v60  ;;  %2738 = vmatpush3.bf16.msra.mxu0 %v3056_v7  ;;  %v3066_v45 = vld [vmem:[#allocation7 + $0xf0] sm:$0xff]  }
 0x240   :  { %2739 = vmatprep.subr.bf16.mxu0 %v3057_v8 }
 0x243   :  { %2740 = vmatpush3.bf16.msra.mxu0 %v3057_v8 }
 0x244   :  { %2741 = vmatprep.subr.bf16.mxu0 %v3058_v46 }
 0x246   :  { %2694 = vmatmul.mubr.bf16.gmra.mrb[28].mxu0 %v3191_v60 }
 0x247   :  { %2742 = vmatpush3.bf16.msra.mxu0 %v3058_v46  ;;  %v3067_v46 = vld [vmem:[#allocation7 + $0xf8] sm:$0xff]  }
 0x248   :  { %2743 = vmatprep.subr.bf16.mxu0 %v3059_v48 }
 0x24b   :  { %2744 = vmatpush3.bf16.msra.mxu0 %v3059_v48  ;;  %v2357_v48 = vld [vmem:[%s3407_s3 + $0x2] ss:$0 sm:$0xff] }
 0x301   :  { %v2683_v9 = vpop.f32.mrb[16].mxu0 }
 0x302   :  { %v665_v10 = vpop.f32.mrb[17].mxu0 }
 0x303   :  { %v2684_v11 = vpop.f32.mrb[18].mxu0 }
 0x304   :  { %v729_v12 = vpack.c.bf16 %v2684_v11, %v2683_v9  ;;  %v668_v13 = vpop.f32.mrb[19].mxu0 }
 0x305   :  { %v728_v14 = vpack.c.bf16 %v668_v13, %v665_v10 }
 0x307   :  { %2697 = vmatprep.subr.bf16.mxu1 %v728_v14 }
 0x308   :  { %2698 = vmatpush3.bf16.msra.mxu1 %v728_v14  ;;  %v3060_v14 = vld [vmem:[#allocation7 + $0xc0] sm:$0xff]  }
 0x309   :  { %v2687_v15 = vpop.f32.mrb[20].mxu0  ;;  %2699 = vmatprep.subr.bf16.mxu1 %v729_v12  ;;  %2793 = vmatprep.subr.bf16.mxu0 %v3060_v14 }
 0x30a   :  { %v681_v17 = vpop.f32.mrb[21].mxu0 }
 0x30b   :  { %v2688_v18 = vpop.f32.mrb[22].mxu0 }
 0x30c   :  { %v731_v19 = vpack.c.bf16 %v2688_v18, %v2687_v15  ;;  %v684_v20 = vpop.f32.mrb[23].mxu0  ;;  %2700 = vmatpush3.bf16.msra.mxu1 %v729_v12  ;;  %v3061_v15 = vld [vmem:[#allocation7 + $0xc8] sm:$0xff]   ;;  %v3063_v18 = vld [vmem:[#allocation7 + $0xd8] sm:$0xff]  }
 0x30d   :  { %v730_v21 = vpack.c.bf16 %v684_v20, %v681_v17  ;;  %v3062_v17 = vld [vmem:[#allocation7 + $0xd0] sm:$0xff]   ;;  %v3065_v20 = vld [vmem:[#allocation7 + $0xe8] sm:$0xff]  }
 0x30f   :  { %2701 = vmatprep.subr.bf16.mxu1 %v730_v21 }
 0x310   :  { %2702 = vmatpush3.bf16.msra.mxu1 %v730_v21 }
 0x311   :  { %v2691_v22 = vpop.f32.mrb[24].mxu0  ;;  %2703 = vmatprep.subr.bf16.mxu1 %v731_v19 }
 0x312   :  { %v697_v23 = vpop.f32.mrb[25].mxu0 }
 0x313   :  { %v2692_v24 = vpop.f32.mrb[26].mxu0 }
 0x314   :  { %v733_v25 = vpack.c.bf16 %v2692_v24, %v2691_v22  ;;  %v700_v26 = vpop.f32.mrb[27].mxu0  ;;  %2704 = vmatpush3.bf16.msra.mxu1 %v731_v19  ;;  %v3064_v19 = vld [vmem:[#allocation7 + $0xe0] sm:$0xff]  }
 0x315   :  { %v732_v27 = vpack.c.bf16 %v700_v26, %v697_v23 }
 0x317   :  { %2705 = vmatprep.subr.bf16.mxu1 %v732_v27 }
 0x318   :  { %2706 = vmatpush3.bf16.msra.mxu1 %v732_v27 }
 0x319   :  { %v2695_v28 = vpop.f32.mrb[28].mxu0  ;;  %2707 = vmatprep.subr.bf16.mxu1 %v733_v25 }
 0x31a   :  { %v713_v29 = vpop.f32.mrb[29].mxu0 }
 0x31b   :  { %v2696_v30 = vpop.f32.mrb[30].mxu0 }
 0x31c   :  { %v735_v31 = vpack.c.bf16 %v2696_v30, %v2695_v28  ;;  %v716_v32 = vpop.f32.mrb[31].mxu0  ;;  %2708 = vmatpush3.bf16.msra.mxu1 %v733_v25 }
 0x31d   :  { %v734_v33 = vpack.c.bf16 %v716_v32, %v713_v29 }
 0x31f   :  { %2709 = vmatprep.subr.bf16.mxu1 %v734_v33 }
 0x320   :  { %2710 = vmatpush3.bf16.msra.mxu1 %v734_v33 }
 0x321   :  { %2711 = vmatprep.subr.bf16.mxu1 %v735_v31 }
 0x324   :  { %2712 = vmatpush3.bf16.msra.mxu1 %v735_v31 }
 0x327   :  { %2714 = vmatmul.mubr.bf16.vlgmr.msra.gmra.mrb[16].mxu1 %v3275_v47 }
 0x328   :  { %2717 = vmatprep.mubr.bf16.mxu1 %v3288_v61 }
 0x32f   :  { %2718 = vmatmul.mubr.bf16.gmra.mrb[20].mxu1 %v3290_v62 }
 0x330   :  { %2721 = vmatprep.mubr.bf16.mxu1 %v3294_v63 }
 0x337   :  { %2722 = vmatmul.mubr.bf16.gmra.mrb[24].mxu1 %v3296_v0 }
 0x338   :  { %2725 = vmatprep.mubr.bf16.mxu1 %v3300_v1 }
 0x33f   :  { %2726 = vmatmul.mubr.bf16.gmra.mrb[28].mxu1 %v3302_v2 }
 0x340   :  { %2777 = vmatprep.mubr.bf16.mxu1 %v3272_v16 }
 0x3fa   :  { %v2715_v50 = vpop.f32.mrb[16].mxu1 }
 0x3fb   :  { %v778_v51 = vpop.f32.mrb[17].mxu1 }
 0x3fc   :  { %v779_v52 = vadd.f32 %v2347_v49, %v778_v51  ;;  %v2716_v53 = vpop.f32.mrb[18].mxu1 }
 0x3fd   :  { %v781_v54 = vpop.f32.mrb[19].mxu1 }
 0x3fe   :  { %v782_v55 = vadd.f32 %v2347_v49, %v781_v54  ;;  %v841_v56 = vmax.f32 %v779_v52, 0.0 }
 0x400   :  { %v842_v57 = vmax.f32 %v782_v55, 0.0 }
 0x402   :  { %v873_v58 = vpack.c.bf16 %v842_v57, %v841_v56  ;;  %v2719_v59 = vpop.f32.mrb[20].mxu1 }
 0x403   :  { %v794_v3 = vpop.f32.mrb[21].mxu1 }
 0x404   :  { %2745 = vmatprep.mubr.bf16.mxu0 %v873_v58  ;;  %v2720_v4 = vpop.f32.mrb[22].mxu1 }
 0x405   :  { %2746 = vmatmul.mubr.bf16.vlgmr.msra.gmra.mrb[32].mxu0 %v3191_v60  ;;  %v797_v5 = vpop.f32.mrb[23].mxu1 }
 0x406   :  { %2749 = vmatprep.mubr.bf16.mxu0 %v3191_v60  ;;  %2794 = vmatpush3.bf16.msra.mxu0 %v3060_v14  ;;  %v3069_v14 = vld [vmem:[#allocation7 + $0x108] sm:$0xff]  }
 0x407   :  { %2795 = vmatprep.subr.bf16.mxu0 %v3061_v15 }
 0x40a   :  { %v2723_v6 = vpop.f32.mrb[24].mxu1  ;;  %2796 = vmatpush3.bf16.msra.mxu0 %v3061_v15  ;;  %v3070_v15 = vld [vmem:[#allocation7 + $0x110] sm:$0xff]  }
 0x40b   :  { %v810_v7 = vpop.f32.mrb[25].mxu1  ;;  %2797 = vmatprep.subr.bf16.mxu0 %v3062_v17 }
 0x40c   :  { %v2724_v8 = vpop.f32.mrb[26].mxu1 }
 0x40d   :  { %2750 = vmatmul.mubr.bf16.gmra.mrb[36].mxu0 %v3191_v60  ;;  %v813_v9 = vpop.f32.mrb[27].mxu1 }
 0x40e   :  { %2753 = vmatprep.mubr.bf16.mxu0 %v3191_v60  ;;  %2798 = vmatpush3.bf16.msra.mxu0 %v3062_v17  ;;  %v3071_v17 = vld [vmem:[#allocation7 + $0x118] sm:$0xff]  }
 0x40f   :  { %2799 = vmatprep.subr.bf16.mxu0 %v3063_v18 }
 0x412   :  { %v2727_v10 = vpop.f32.mrb[28].mxu1  ;;  %2800 = vmatpush3.bf16.msra.mxu0 %v3063_v18  ;;  %v3072_v18 = vld [vmem:[#allocation7 + $0x120] sm:$0xff]  }
 0x413   :  { %v826_v11 = vpop.f32.mrb[29].mxu1  ;;  %2801 = vmatprep.subr.bf16.mxu0 %v3064_v19 }
 0x414   :  { %v2728_v12 = vpop.f32.mrb[30].mxu1 }
 0x415   :  { %2754 = vmatmul.mubr.bf16.gmra.mrb[40].mxu0 %v3191_v60  ;;  %v829_v13 = vpop.f32.mrb[31].mxu1 }
 0x416   :  { %2757 = vmatprep.mubr.bf16.mxu0 %v3191_v60  ;;  %2802 = vmatpush3.bf16.msra.mxu0 %v3064_v19  ;;  %v3068_v13 = vld [vmem:[#allocation7 + $0x100] sm:$0xff]   ;;  %v3073_v19 = vld [vmem:[#allocation7 + $0x128] sm:$0xff]  }
 0x417   :  { %2803 = vmatprep.subr.bf16.mxu0 %v3065_v20 }
 0x41a   :  { %2804 = vmatpush3.bf16.msra.mxu0 %v3065_v20 }
 0x41b   :  { %2805 = vmatprep.subr.bf16.mxu0 %v3066_v45 }
 0x41d   :  { %2758 = vmatmul.mubr.bf16.gmra.mrb[44].mxu0 %v3191_v60 }
 0x41e   :  { %2806 = vmatpush3.bf16.msra.mxu0 %v3066_v45  ;;  %v3075_v45 = vld [vmem:[#allocation7 + $0x138] sm:$0xff]  }
 0x41f   :  { %2807 = vmatprep.subr.bf16.mxu0 %v3067_v46 }
 0x422   :  { %2808 = vmatpush3.bf16.msra.mxu0 %v3067_v46  ;;  %v2367_v46 = vld [vmem:[%s3407_s3 + $0x3] ss:$0 sm:$0xff] }
 0x423   :  { %2857 = vmatprep.subr.bf16.mxu0 %v3068_v13 }
 0x4d8   :  { %v2747_v21 = vpop.f32.mrb[32].mxu0 }
 0x4d9   :  { %v980_v22 = vpop.f32.mrb[33].mxu0 }
 0x4da   :  { %v2748_v23 = vpop.f32.mrb[34].mxu0 }
 0x4db   :  { %v1044_v24 = vpack.c.bf16 %v2748_v23, %v2747_v21  ;;  %v983_v25 = vpop.f32.mrb[35].mxu0 }
 0x4dc   :  { %v1043_v26 = vpack.c.bf16 %v983_v25, %v980_v22 }
 0x4de   :  { %2761 = vmatprep.subr.bf16.mxu1 %v1043_v26 }
 0x4df   :  { %2762 = vmatpush3.bf16.msra.mxu1 %v1043_v26 }
 0x4e0   :  { %v2751_v27 = vpop.f32.mrb[36].mxu0  ;;  %2763 = vmatprep.subr.bf16.mxu1 %v1044_v24 }
 0x4e1   :  { %v996_v28 = vpop.f32.mrb[37].mxu0 }
 0x4e2   :  { %v2752_v29 = vpop.f32.mrb[38].mxu0 }
 0x4e3   :  { %v1046_v30 = vpack.c.bf16 %v2752_v29, %v2751_v27  ;;  %v999_v31 = vpop.f32.mrb[39].mxu0  ;;  %2764 = vmatpush3.bf16.msra.mxu1 %v1044_v24 }
 0x4e4   :  { %v1045_v32 = vpack.c.bf16 %v999_v31, %v996_v28 }
 0x4e6   :  { %2765 = vmatprep.subr.bf16.mxu1 %v1045_v32 }
 0x4e7   :  { %2766 = vmatpush3.bf16.msra.mxu1 %v1045_v32 }
 0x4e8   :  { %v2755_v33 = vpop.f32.mrb[40].mxu0  ;;  %2767 = vmatprep.subr.bf16.mxu1 %v1046_v30 }
 0x4e9   :  { %v1012_v34 = vpop.f32.mrb[41].mxu0 }
 0x4ea   :  { %v2756_v35 = vpop.f32.mrb[42].mxu0 }
 0x4eb   :  { %v1048_v36 = vpack.c.bf16 %v2756_v35, %v2755_v33  ;;  %v1015_v37 = vpop.f32.mrb[43].mxu0  ;;  %2768 = vmatpush3.bf16.msra.mxu1 %v1046_v30 }
 0x4ec   :  { %v1047_v38 = vpack.c.bf16 %v1015_v37, %v1012_v34 }
 0x4ee   :  { %2769 = vmatprep.subr.bf16.mxu1 %v1047_v38 }
 0x4ef   :  { %2770 = vmatpush3.bf16.msra.mxu1 %v1047_v38 }
 0x4f0   :  { %v2759_v39 = vpop.f32.mrb[44].mxu0  ;;  %2771 = vmatprep.subr.bf16.mxu1 %v1048_v36 }
 0x4f1   :  { %v1028_v40 = vpop.f32.mrb[45].mxu0 }
 0x4f2   :  { %v2760_v41 = vpop.f32.mrb[46].mxu0 }
 0x4f3   :  { %v1050_v42 = vpack.c.bf16 %v2760_v41, %v2759_v39  ;;  %v1031_v43 = vpop.f32.mrb[47].mxu0  ;;  %2772 = vmatpush3.bf16.msra.mxu1 %v1048_v36 }
 0x4f4   :  { %v1049_v44 = vpack.c.bf16 %v1031_v43, %v1028_v40 }
 0x4f6   :  { %2773 = vmatprep.subr.bf16.mxu1 %v1049_v44 }
 0x4f7   :  { %2774 = vmatpush3.bf16.msra.mxu1 %v1049_v44  ;;  %v3074_v44 = vld [vmem:[#allocation7 + $0x130] sm:$0xff]  }
 0x4f8   :  { %2775 = vmatprep.subr.bf16.mxu1 %v1050_v42 }
 0x4fb   :  { %2776 = vmatpush3.bf16.msra.mxu1 %v1050_v42 }
 0x4fe   :  { %2778 = vmatmul.mubr.bf16.vlgmr.msra.gmra.mrb[32].mxu1 %v3275_v47 }
 0x4ff   :  { %2781 = vmatprep.mubr.bf16.mxu1 %v3288_v61 }
 0x506   :  { %2782 = vmatmul.mubr.bf16.gmra.mrb[36].mxu1 %v3290_v62 }
 0x507   :  { %2785 = vmatprep.mubr.bf16.mxu1 %v3294_v63 }
 0x50e   :  { %2786 = vmatmul.mubr.bf16.gmra.mrb[40].mxu1 %v3296_v0 }
 0x50f   :  { %2789 = vmatprep.mubr.bf16.mxu1 %v3300_v1 }
 0x516   :  { %2790 = vmatmul.mubr.bf16.gmra.mrb[44].mxu1 %v3302_v2 }
 0x517   :  { %2841 = vmatprep.mubr.bf16.mxu1 %v3272_v16 }
 0x5d1   :  { %v2779_v49 = vpop.f32.mrb[32].mxu1 }
 0x5d2   :  { %v1093_v50 = vpop.f32.mrb[33].mxu1 }
 0x5d3   :  { %v1094_v51 = vadd.f32 %v2357_v48, %v1093_v50  ;;  %v2780_v52 = vpop.f32.mrb[34].mxu1 }
 0x5d4   :  { %v1096_v53 = vpop.f32.mrb[35].mxu1 }
 0x5d5   :  { %v1097_v54 = vadd.f32 %v2357_v48, %v1096_v53  ;;  %v1156_v55 = vmax.f32 %v1094_v51, 0.0 }
 0x5d7   :  { %v1157_v56 = vmax.f32 %v1097_v54, 0.0 }
 0x5d9   :  { %v1188_v57 = vpack.c.bf16 %v1157_v56, %v1156_v55  ;;  %v2783_v58 = vpop.f32.mrb[36].mxu1 }
 0x5da   :  { %v1109_v59 = vpop.f32.mrb[37].mxu1 }
 0x5db   :  { %2809 = vmatprep.mubr.bf16.mxu0 %v1188_v57  ;;  %v2784_v3 = vpop.f32.mrb[38].mxu1 }
 0x5dc   :  { %2810 = vmatmul.mubr.bf16.vlgmr.msra.gmra.mrb[48].mxu0 %v3191_v60  ;;  %v1112_v4 = vpop.f32.mrb[39].mxu1 }
 0x5dd   :  { %2813 = vmatprep.mubr.bf16.mxu0 %v3191_v60  ;;  %2858 = vmatpush3.bf16.msra.mxu0 %v3068_v13  ;;  %v3077_v13 = vld [vmem:[#allocation7 + $0x148] sm:$0xff]  }
 0x5de   :  { %2859 = vmatprep.subr.bf16.mxu0 %v3069_v14 }
 0x5e1   :  { %v2787_v5 = vpop.f32.mrb[40].mxu1  ;;  %2860 = vmatpush3.bf16.msra.mxu0 %v3069_v14  ;;  %v3078_v14 = vld [vmem:[#allocation7 + $0x150] sm:$0xff]  }
 0x5e2   :  { %v1125_v6 = vpop.f32.mrb[41].mxu1  ;;  %2861 = vmatprep.subr.bf16.mxu0 %v3070_v15 }
 0x5e3   :  { %v2788_v7 = vpop.f32.mrb[42].mxu1 }
 0x5e4   :  { %2814 = vmatmul.mubr.bf16.gmra.mrb[52].mxu0 %v3191_v60  ;;  %v1128_v8 = vpop.f32.mrb[43].mxu1 }
 0x5e5   :  { %2817 = vmatprep.mubr.bf16.mxu0 %v3191_v60  ;;  %2862 = vmatpush3.bf16.msra.mxu0 %v3070_v15  ;;  %v3079_v15 = vld [vmem:[#allocation7 + $0x158] sm:$0xff]  }
 0x5e6   :  { %2863 = vmatprep.subr.bf16.mxu0 %v3071_v17 }
 0x5e9   :  { %v2791_v9 = vpop.f32.mrb[44].mxu1  ;;  %2864 = vmatpush3.bf16.msra.mxu0 %v3071_v17  ;;  %v3080_v17 = vld [vmem:[#allocation7 + $0x160] sm:$0xff]  }
 0x5ea   :  { %v1141_v10 = vpop.f32.mrb[45].mxu1  ;;  %2865 = vmatprep.subr.bf16.mxu0 %v3072_v18 }
 0x5eb   :  { %v2792_v11 = vpop.f32.mrb[46].mxu1 }
 0x5ec   :  { %2818 = vmatmul.mubr.bf16.gmra.mrb[56].mxu0 %v3191_v60  ;;  %v1144_v12 = vpop.f32.mrb[47].mxu1 }
 0x5ed   :  { %2821 = vmatprep.mubr.bf16.mxu0 %v3191_v60  ;;  %2866 = vmatpush3.bf16.msra.mxu0 %v3072_v18  ;;  %v3076_v12 = vld [vmem:[#allocation7 + $0x140] sm:$0xff]   ;;  %v3081_v18 = vld [vmem:[#allocation7 + $0x168] sm:$0xff]  }
 0x5ee   :  { %2867 = vmatprep.subr.bf16.mxu0 %v3073_v19 }
 0x5f1   :  { %2868 = vmatpush3.bf16.msra.mxu0 %v3073_v19 }
 0x5f2   :  { %2869 = vmatprep.subr.bf16.mxu0 %v3074_v44 }
 0x5f4   :  { %2822 = vmatmul.mubr.bf16.gmra.mrb[60].mxu0 %v3191_v60 }
 0x5f5   :  { %2870 = vmatpush3.bf16.msra.mxu0 %v3074_v44  ;;  %v3083_v44 = vld [vmem:[#allocation7 + $0x178] sm:$0xff]  }
 0x5f6   :  { %2871 = vmatprep.subr.bf16.mxu0 %v3075_v45 }
 0x5f9   :  { %2872 = vmatpush3.bf16.msra.mxu0 %v3075_v45  ;;  %v2377_v45 = vld [vmem:[%s3407_s3 + $0x4] ss:$0 sm:$0xff] }
 0x5fa   :  { %2921 = vmatprep.subr.bf16.mxu0 %v3076_v12 }
 0x6af   :  { %v2811_v20 = vpop.f32.mrb[48].mxu0 }
 0x6b0   :  { %v1295_v21 = vpop.f32.mrb[49].mxu0 }
 0x6b1   :  { %v2812_v22 = vpop.f32.mrb[50].mxu0 }
 0x6b2   :  { %v1359_v23 = vpack.c.bf16 %v2812_v22, %v2811_v20  ;;  %v1298_v24 = vpop.f32.mrb[51].mxu0 }
 0x6b3   :  { %v1358_v25 = vpack.c.bf16 %v1298_v24, %v1295_v21 }
 0x6b5   :  { %2825 = vmatprep.subr.bf16.mxu1 %v1358_v25 }
 0x6b6   :  { %2826 = vmatpush3.bf16.msra.mxu1 %v1358_v25 }
 0x6b7   :  { %v2815_v26 = vpop.f32.mrb[52].mxu0  ;;  %2827 = vmatprep.subr.bf16.mxu1 %v1359_v23 }
 0x6b8   :  { %v1311_v27 = vpop.f32.mrb[53].mxu0 }
 0x6b9   :  { %v2816_v28 = vpop.f32.mrb[54].mxu0 }
 0x6ba   :  { %v1361_v29 = vpack.c.bf16 %v2816_v28, %v2815_v26  ;;  %v1314_v30 = vpop.f32.mrb[55].mxu0  ;;  %2828 = vmatpush3.bf16.msra.mxu1 %v1359_v23 }
 0x6bb   :  { %v1360_v31 = vpack.c.bf16 %v1314_v30, %v1311_v27 }
 0x6bd   :  { %2829 = vmatprep.subr.bf16.mxu1 %v1360_v31 }
 0x6be   :  { %2830 = vmatpush3.bf16.msra.mxu1 %v1360_v31 }
 0x6bf   :  { %v2819_v32 = vpop.f32.mrb[56].mxu0  ;;  %2831 = vmatprep.subr.bf16.mxu1 %v1361_v29 }
 0x6c0   :  { %v1327_v33 = vpop.f32.mrb[57].mxu0 }
 0x6c1   :  { %v2820_v34 = vpop.f32.mrb[58].mxu0 }
 0x6c2   :  { %v1363_v35 = vpack.c.bf16 %v2820_v34, %v2819_v32  ;;  %v1330_v36 = vpop.f32.mrb[59].mxu0  ;;  %2832 = vmatpush3.bf16.msra.mxu1 %v1361_v29 }
 0x6c3   :  { %v1362_v37 = vpack.c.bf16 %v1330_v36, %v1327_v33 }
 0x6c5   :  { %2833 = vmatprep.subr.bf16.mxu1 %v1362_v37 }
 0x6c6   :  { %2834 = vmatpush3.bf16.msra.mxu1 %v1362_v37 }
 0x6c7   :  { %v2823_v38 = vpop.f32.mrb[60].mxu0  ;;  %2835 = vmatprep.subr.bf16.mxu1 %v1363_v35 }
 0x6c8   :  { %v1343_v39 = vpop.f32.mrb[61].mxu0 }
 0x6c9   :  { %v2824_v40 = vpop.f32.mrb[62].mxu0 }
 0x6ca   :  { %v1365_v41 = vpack.c.bf16 %v2824_v40, %v2823_v38  ;;  %v1346_v42 = vpop.f32.mrb[63].mxu0  ;;  %2836 = vmatpush3.bf16.msra.mxu1 %v1363_v35 }
 0x6cb   :  { %v1364_v43 = vpack.c.bf16 %v1346_v42, %v1343_v39 }
 0x6cd   :  { %2837 = vmatprep.subr.bf16.mxu1 %v1364_v43 }
 0x6ce   :  { %2838 = vmatpush3.bf16.msra.mxu1 %v1364_v43  ;;  %v3082_v43 = vld [vmem:[#allocation7 + $0x170] sm:$0xff]  }
 0x6cf   :  { %2839 = vmatprep.subr.bf16.mxu1 %v1365_v41 }
 0x6d2   :  { %2840 = vmatpush3.bf16.msra.mxu1 %v1365_v41 }
 0x6d5   :  { %2842 = vmatmul.mubr.bf16.vlgmr.msra.gmra.mrb[48].mxu1 %v3275_v47 }
 0x6d6   :  { %2845 = vmatprep.mubr.bf16.mxu1 %v3288_v61 }
 0x6dd   :  { %2846 = vmatmul.mubr.bf16.gmra.mrb[52].mxu1 %v3290_v62 }
 0x6de   :  { %2849 = vmatprep.mubr.bf16.mxu1 %v3294_v63 }
 0x6e5   :  { %2850 = vmatmul.mubr.bf16.gmra.mrb[56].mxu1 %v3296_v0 }
 0x6e6   :  { %2853 = vmatprep.mubr.bf16.mxu1 %v3300_v1 }
 0x6ed   :  { %2854 = vmatmul.mubr.bf16.gmra.mrb[60].mxu1 %v3302_v2 }
 0x6ee   :  { %2905 = vmatprep.mubr.bf16.mxu1 %v3272_v16 }
 0x7a8   :  { %v2843_v48 = vpop.f32.mrb[48].mxu1 }
 0x7a9   :  { %v1408_v49 = vpop.f32.mrb[49].mxu1 }
 0x7aa   :  { %v1409_v50 = vadd.f32 %v2367_v46, %v1408_v49  ;;  %v2844_v51 = vpop.f32.mrb[50].mxu1 }
 0x7ab   :  { %v1411_v52 = vpop.f32.mrb[51].mxu1 }
 0x7ac   :  { %v1412_v53 = vadd.f32 %v2367_v46, %v1411_v52  ;;  %v1471_v54 = vmax.f32 %v1409_v50, 0.0 }
 0x7ae   :  { %v1472_v55 = vmax.f32 %v1412_v53, 0.0 }
 0x7b0   :  { %v1503_v56 = vpack.c.bf16 %v1472_v55, %v1471_v54  ;;  %v2847_v57 = vpop.f32.mrb[52].mxu1 }
 0x7b1   :  { %v1424_v58 = vpop.f32.mrb[53].mxu1 }
 0x7b2   :  { %2873 = vmatprep.mubr.bf16.mxu0 %v1503_v56  ;;  %v2848_v59 = vpop.f32.mrb[54].mxu1 }
 0x7b3   :  { %2874 = vmatmul.mubr.bf16.vlgmr.msra.gmra.mrb[64].mxu0 %v3191_v60  ;;  %v1427_v3 = vpop.f32.mrb[55].mxu1 }
 0x7b4   :  { %2877 = vmatprep.mubr.bf16.mxu0 %v3191_v60  ;;  %2922 = vmatpush3.bf16.msra.mxu0 %v3076_v12 }
 0x7b5   :  { %2923 = vmatprep.subr.bf16.mxu0 %v3077_v13 }
 0x7b8   :  { %v2851_v4 = vpop.f32.mrb[56].mxu1  ;;  %2924 = vmatpush3.bf16.msra.mxu0 %v3077_v13 }
 0x7b9   :  { %v1440_v5 = vpop.f32.mrb[57].mxu1  ;;  %2925 = vmatprep.subr.bf16.mxu0 %v3078_v14 }
 0x7ba   :  { %v2852_v6 = vpop.f32.mrb[58].mxu1 }
 0x7bb   :  { %2878 = vmatmul.mubr.bf16.gmra.mrb[68].mxu0 %v3191_v60  ;;  %v1443_v7 = vpop.f32.mrb[59].mxu1 }
 0x7bc   :  { %2881 = vmatprep.mubr.bf16.mxu0 %v3191_v60  ;;  %2926 = vmatpush3.bf16.msra.mxu0 %v3078_v14 }
 0x7bd   :  { %2927 = vmatprep.subr.bf16.mxu0 %v3079_v15 }
 0x7c0   :  { %v2855_v8 = vpop.f32.mrb[60].mxu1  ;;  %2928 = vmatpush3.bf16.msra.mxu0 %v3079_v15 }
 0x7c1   :  { %v1456_v9 = vpop.f32.mrb[61].mxu1  ;;  %2929 = vmatprep.subr.bf16.mxu0 %v3080_v17 }
 0x7c2   :  { %v2856_v10 = vpop.f32.mrb[62].mxu1 }
 0x7c3   :  { %2882 = vmatmul.mubr.bf16.gmra.mrb[72].mxu0 %v3191_v60  ;;  %v1459_v11 = vpop.f32.mrb[63].mxu1 }
 0x7c4   :  { %2885 = vmatprep.mubr.bf16.mxu0 %v3191_v60  ;;  %2930 = vmatpush3.bf16.msra.mxu0 %v3080_v17 }
 0x7c5   :  { %2931 = vmatprep.subr.bf16.mxu0 %v3081_v18 }
 0x7c8   :  { %2932 = vmatpush3.bf16.msra.mxu0 %v3081_v18 }
 0x7c9   :  { %2933 = vmatprep.subr.bf16.mxu0 %v3082_v43 }
 0x7cb   :  { %2886 = vmatmul.mubr.bf16.gmra.mrb[76].mxu0 %v3191_v60 }
 0x7cc   :  { %2934 = vmatpush3.bf16.msra.mxu0 %v3082_v43 }
 0x7cd   :  { %2935 = vmatprep.subr.bf16.mxu0 %v3083_v44 }
 0x7d0   :  { %2936 = vmatpush3.bf16.msra.mxu0 %v3083_v44 }
 0x886   :  { %v2875_v19 = vpop.f32.mrb[64].mxu0 }
 0x887   :  { %v1610_v20 = vpop.f32.mrb[65].mxu0 }
 0x888   :  { %v2876_v21 = vpop.f32.mrb[66].mxu0 }
 0x889   :  { %v1674_v22 = vpack.c.bf16 %v2876_v21, %v2875_v19  ;;  %v1613_v23 = vpop.f32.mrb[67].mxu0 }
 0x88a   :  { %v1673_v24 = vpack.c.bf16 %v1613_v23, %v1610_v20 }
 0x88c   :  { %2889 = vmatprep.subr.bf16.mxu1 %v1673_v24 }
 0x88d   :  { %2890 = vmatpush3.bf16.msra.mxu1 %v1673_v24 }
 0x88e   :  { %v2879_v25 = vpop.f32.mrb[68].mxu0  ;;  %2891 = vmatprep.subr.bf16.mxu1 %v1674_v22 }
 0x88f   :  { %v1626_v26 = vpop.f32.mrb[69].mxu0 }
 0x890   :  { %v2880_v27 = vpop.f32.mrb[70].mxu0 }
 0x891   :  { %v1676_v28 = vpack.c.bf16 %v2880_v27, %v2879_v25  ;;  %v1629_v29 = vpop.f32.mrb[71].mxu0  ;;  %2892 = vmatpush3.bf16.msra.mxu1 %v1674_v22 }
 0x892   :  { %v1675_v30 = vpack.c.bf16 %v1629_v29, %v1626_v26 }
 0x894   :  { %2893 = vmatprep.subr.bf16.mxu1 %v1675_v30 }
 0x895   :  { %2894 = vmatpush3.bf16.msra.mxu1 %v1675_v30 }
 0x896   :  { %v2883_v31 = vpop.f32.mrb[72].mxu0  ;;  %2895 = vmatprep.subr.bf16.mxu1 %v1676_v28 }
 0x897   :  { %v1642_v32 = vpop.f32.mrb[73].mxu0 }
 0x898   :  { %v2884_v33 = vpop.f32.mrb[74].mxu0 }
 0x899   :  { %v1678_v34 = vpack.c.bf16 %v2884_v33, %v2883_v31  ;;  %v1645_v35 = vpop.f32.mrb[75].mxu0  ;;  %2896 = vmatpush3.bf16.msra.mxu1 %v1676_v28 }
 0x89a   :  { %v1677_v36 = vpack.c.bf16 %v1645_v35, %v1642_v32  ;;  %v3084_v35 = vld [vmem:[#allocation7 + $0x180] sm:$0xff]  }
 0x89c   :  { %2897 = vmatprep.subr.bf16.mxu1 %v1677_v36 }
 0x89d   :  { %2898 = vmatpush3.bf16.msra.mxu1 %v1677_v36 }
 0x89e   :  { %v2887_v37 = vpop.f32.mrb[76].mxu0  ;;  %2899 = vmatprep.subr.bf16.mxu1 %v1678_v34 }
 0x89f   :  { %v1658_v38 = vpop.f32.mrb[77].mxu0 }
 0x8a0   :  { %v2888_v39 = vpop.f32.mrb[78].mxu0 }
 0x8a1   :  { %v1680_v40 = vpack.c.bf16 %v2888_v39, %v2887_v37  ;;  %v1661_v41 = vpop.f32.mrb[79].mxu0  ;;  %2900 = vmatpush3.bf16.msra.mxu1 %v1678_v34  ;;  %v3192_v34 = vmov 0.0  }
 0x8a2   :  { %v1679_v42 = vpack.c.bf16 %v1661_v41, %v1658_v38  ;;  %2985 = vmatprep.subr.bf16.mxu0 %v3192_v34 }
 0x8a4   :  { %2901 = vmatprep.subr.bf16.mxu1 %v1679_v42 }
 0x8a5   :  { %2902 = vmatpush3.bf16.msra.mxu1 %v1679_v42 }
 0x8a6   :  { %2903 = vmatprep.subr.bf16.mxu1 %v1680_v40 }
 0x8a9   :  { %2904 = vmatpush3.bf16.msra.mxu1 %v1680_v40 }
 0x8ac   :  { %2906 = vmatmul.mubr.bf16.vlgmr.msra.gmra.mrb[64].mxu1 %v3275_v47 }
 0x8ad   :  { %2909 = vmatprep.mubr.bf16.mxu1 %v3288_v61 }
 0x8b4   :  { %2910 = vmatmul.mubr.bf16.gmra.mrb[68].mxu1 %v3290_v62 }
 0x8b5   :  { %2913 = vmatprep.mubr.bf16.mxu1 %v3294_v63 }
 0x8bc   :  { %2914 = vmatmul.mubr.bf16.gmra.mrb[72].mxu1 %v3296_v0 }
 0x8bd   :  { %2917 = vmatprep.mubr.bf16.mxu1 %v3300_v1 }
 0x8c4   :  { %2918 = vmatmul.mubr.bf16.gmra.mrb[76].mxu1 %v3302_v2 }
 0x8c5   :  { %2969 = vmatprep.mubr.bf16.mxu1 %v3272_v16 }
 0x97f   :  { %v2907_v46 = vpop.f32.mrb[64].mxu1 }
 0x980   :  { %v1723_v48 = vpop.f32.mrb[65].mxu1 }
 0x981   :  { %v1724_v49 = vadd.f32 %v2377_v45, %v1723_v48  ;;  %v2908_v50 = vpop.f32.mrb[66].mxu1  ;;  %v2141_v48 = vld [vmem:[#allocation2 + $0x40] sm:$0xf] }
 0x982   :  { %v1726_v51 = vpop.f32.mrb[67].mxu1 }
 0x983   :  { %v1727_v52 = vadd.f32 %v2377_v45, %v1726_v51  ;;  %v1786_v53 = vmax.f32 %v1724_v49, 0.0 }
 0x985   :  { %v1787_v54 = vmax.f32 %v1727_v52, 0.0 }
 0x987   :  { %v1818_v55 = vpack.c.bf16 %v1787_v54, %v1786_v53  ;;  %v2911_v16 = vpop.f32.mrb[68].mxu1 }
 0x988   :  { %v1739_v56 = vpop.f32.mrb[69].mxu1 }
 0x989   :  { %2937 = vmatprep.mubr.bf16.mxu0 %v1818_v55  ;;  %v2912_v57 = vpop.f32.mrb[70].mxu1 }
 0x98a   :  { %2938 = vmatmul.mubr.bf16.vlgmr.msra.gmra.mrb[80].mxu0 %v3191_v60  ;;  %v1742_v58 = vpop.f32.mrb[71].mxu1 }
 0x98b   :  { %2941 = vmatprep.mubr.bf16.mxu0 %v3191_v60  ;;  %v3091_v58 = vld [vmem:[#allocation7 + $0x1b8] sm:$0xff]  }
 0x98f   :  { %v2915_v59 = vpop.f32.mrb[72].mxu1 }
 0x990   :  { %v1755_v3 = vpop.f32.mrb[73].mxu1 }
 0x991   :  { %v2916_v4 = vpop.f32.mrb[74].mxu1 }
 0x992   :  { %2942 = vmatmul.mubr.bf16.gmra.mrb[84].mxu0 %v3191_v60  ;;  %v1758_v5 = vpop.f32.mrb[75].mxu1 }
 0x993   :  { %2945 = vmatprep.mubr.bf16.mxu0 %v3191_v60 }
 0x997   :  { %v2919_v6 = vpop.f32.mrb[76].mxu1 }
 0x998   :  { %v1771_v7 = vpop.f32.mrb[77].mxu1 }
 0x999   :  { %v2920_v8 = vpop.f32.mrb[78].mxu1  ;;  %v2389_v7 = vld [vmem:[%s3407_s3 + $0x6] ss:$0 sm:$0xff] }
 0x99a   :  { %2946 = vmatmul.mubr.bf16.gmra.mrb[88].mxu0 %v3191_v60  ;;  %v1774_v9 = vpop.f32.mrb[79].mxu1 }
 0x99b   :  { %2949 = vmatprep.mubr.bf16.mxu0 %v3191_v60 }
 0x9a2   :  { %2950 = vmatmul.mubr.bf16.gmra.mrb[92].mxu0 %v3191_v60 }
 0x9a3   :  { %2987 = vmatprep.mubr.msk.bf16.mxu0 %vm3193_vm0, %v3192_v34 }
 0xa5d   :  { %v2939_v10 = vpop.f32.mrb[80].mxu0 }
 0xa5e   :  { %v1925_v11 = vpop.f32.mrb[81].mxu0 }
 0xa5f   :  { %v2940_v12 = vpop.f32.mrb[82].mxu0 }
 0xa60   :  { %v1989_v13 = vpack.c.bf16 %v2940_v12, %v2939_v10  ;;  %v1928_v14 = vpop.f32.mrb[83].mxu0 }
 0xa61   :  { %v1988_v15 = vpack.c.bf16 %v1928_v14, %v1925_v11 }
 0xa63   :  { %2953 = vmatprep.subr.bf16.mxu1 %v1988_v15 }
 0xa64   :  { %2954 = vmatpush3.bf16.msra.mxu1 %v1988_v15 }
 0xa65   :  { %v2943_v17 = vpop.f32.mrb[84].mxu0  ;;  %2955 = vmatprep.subr.bf16.mxu1 %v1989_v13 }
 0xa66   :  { %v1941_v18 = vpop.f32.mrb[85].mxu0 }
 0xa67   :  { %v2944_v19 = vpop.f32.mrb[86].mxu0 }
 0xa68   :  { %v1991_v20 = vpack.c.bf16 %v2944_v19, %v2943_v17  ;;  %v1944_v21 = vpop.f32.mrb[87].mxu0  ;;  %2956 = vmatpush3.bf16.msra.mxu1 %v1989_v13 }
 0xa69   :  { %v1990_v22 = vpack.c.bf16 %v1944_v21, %v1941_v18 }
 0xa6b   :  { %2957 = vmatprep.subr.bf16.mxu1 %v1990_v22 }
 0xa6c   :  { %2958 = vmatpush3.bf16.msra.mxu1 %v1990_v22 }
 0xa6d   :  { %v2947_v23 = vpop.f32.mrb[88].mxu0  ;;  %2959 = vmatprep.subr.bf16.mxu1 %v1991_v20 }
 0xa6e   :  { %v1957_v60 = vpop.f32.mrb[89].mxu0 }
 0xa6f   :  { %v2948_v24 = vpop.f32.mrb[90].mxu0 }
 0xa70   :  { %v1993_v25 = vpack.c.bf16 %v2948_v24, %v2947_v23  ;;  %v1960_v26 = vpop.f32.mrb[91].mxu0  ;;  %2960 = vmatpush3.bf16.msra.mxu1 %v1991_v20 }
 0xa71   :  { %v1992_v27 = vpack.c.bf16 %v1960_v26, %v1957_v60 }
 0xa73   :  { %2961 = vmatprep.subr.bf16.mxu1 %v1992_v27 }
 0xa74   :  { %2962 = vmatpush3.bf16.msra.mxu1 %v1992_v27 }
 0xa75   :  { %v2951_v28 = vpop.f32.mrb[92].mxu0  ;;  %2963 = vmatprep.subr.bf16.mxu1 %v1993_v25 }
 0xa76   :  { %v1973_v29 = vpop.f32.mrb[93].mxu0 }
 0xa77   :  { %v2952_v30 = vpop.f32.mrb[94].mxu0 }
 0xa78   :  { %v1995_v31 = vpack.c.bf16 %v2952_v30, %v2951_v28  ;;  %v1976_v32 = vpop.f32.mrb[95].mxu0  ;;  %2964 = vmatpush3.bf16.msra.mxu1 %v1993_v25 }
 0xa79   :  { %v1994_v33 = vpack.c.bf16 %v1976_v32, %v1973_v29 }
 0xa7b   :  { %2965 = vmatprep.subr.bf16.mxu1 %v1994_v33 }
 0xa7c   :  { %2966 = vmatpush3.bf16.msra.mxu1 %v1994_v33 }
 0xa7d   :  { %2967 = vmatprep.subr.bf16.mxu1 %v1995_v31 }
 0xa80   :  { %2968 = vmatpush3.bf16.msra.mxu1 %v1995_v31 }
 0xa81   :  { %2991 = vmatprep.subr.bf16.mxu1 %v3192_v34 }
 0xa83   :  { %2970 = vmatmul.mubr.bf16.vlgmr.msra.gmra.mrb[80].mxu1 %v3275_v47  ;;  %v3085_v47 = vld [vmem:[#allocation7 + $0x188] sm:$0xff]  }
 0xa84   :  { %2973 = vmatprep.mubr.bf16.mxu1 %v3288_v61  ;;  %2992 = vmatpush3.bf16.msra.mxu1 %v3084_v35  ;;  %v3086_v61 = vld [vmem:[#allocation7 + $0x190] sm:$0xff]  }
 0xa85   :  { %2993 = vmatprep.subr.bf16.mxu1 %v3192_v34 }
 0xa88   :  { %2994 = vmatpush3.bf16.msra.mxu1 %v3085_v47 }
 0xa89   :  { %2995 = vmatprep.subr.bf16.mxu1 %v3192_v34 }
 0xa8b   :  { %2974 = vmatmul.mubr.bf16.gmra.mrb[84].mxu1 %v3290_v62  ;;  %v3087_v62 = vld [vmem:[#allocation7 + $0x198] sm:$0xff]  }
 0xa8c   :  { %2977 = vmatprep.mubr.bf16.mxu1 %v3294_v63  ;;  %2996 = vmatpush3.bf16.msra.mxu1 %v3086_v61  ;;  %v3088_v63 = vld [vmem:[#allocation7 + $0x1a0] sm:$0xff]  }
 0xa8d   :  { %2997 = vmatprep.subr.bf16.mxu1 %v3192_v34 }
 0xa90   :  { %2998 = vmatpush3.bf16.msra.mxu1 %v3087_v62 }
 0xa91   :  { %2999 = vmatprep.subr.bf16.mxu1 %v3192_v34 }
 0xa93   :  { %2978 = vmatmul.mubr.bf16.gmra.mrb[88].mxu1 %v3296_v0  ;;  %v3089_v0 = vld [vmem:[#allocation7 + $0x1a8] sm:$0xff]  }
 0xa94   :  { %2981 = vmatprep.mubr.bf16.mxu1 %v3300_v1  ;;  %3000 = vmatpush3.bf16.msra.mxu1 %v3088_v63  ;;  %v3090_v1 = vld [vmem:[#allocation7 + $0x1b0] sm:$0xff]  }
 0xa95   :  { %3001 = vmatprep.subr.bf16.mxu1 %v3192_v34 }
 0xa98   :  { %3002 = vmatpush3.bf16.msra.mxu1 %v3089_v0 }
 0xa99   :  { %3003 = vmatprep.subr.bf16.mxu1 %v3192_v34 }
 0xa9b   :  { %2982 = vmatmul.mubr.bf16.gmra.mrb[92].mxu1 %v3302_v2  ;;  %v2387_v2 = vld [vmem:[%s3407_s3 + $0x5] ss:$0 sm:$0xff] }
 0xa9c   :  { %3007 = vmatprep.mubr.msk.bf16.mxu1 %vm3193_vm0, %v3192_v34  ;;  %3004 = vmatpush3.bf16.msra.mxu1 %v3090_v1 }
 0xa9d   :  { %3005 = vmatprep.subr.bf16.mxu1 %v3192_v34 }
 0xaa0   :  { %3006 = vmatpush3.bf16.msra.mxu1 %v3091_v58 }
 0xb56   :  { %v2971_v36 = vpop.f32.mrb[80].mxu1 }
 0xb57   :  { %v2038_v37 = vpop.f32.mrb[81].mxu1 }
 0xb58   :  { %v2039_v38 = vadd.f32 %v2387_v2, %v2038_v37  ;;  %v2972_v39 = vpop.f32.mrb[82].mxu1 }
 0xb59   :  { %v2041_v40 = vpop.f32.mrb[83].mxu1 }
 0xb5a   :  { %v2042_v41 = vadd.f32 %v2387_v2, %v2041_v40  ;;  %v2101_v42 = vmax.f32 %v2039_v38, 0.0 }
 0xb5c   :  { %v2102_v43 = vmax.f32 %v2042_v41, 0.0 }
 0xb5e   :  { %v2133_v44 = vpack.c.bf16 %v2102_v43, %v2101_v42  ;;  %v2975_v45 = vpop.f32.mrb[84].mxu1 }
 0xb5f   :  { %v2054_v46 = vpop.f32.mrb[85].mxu1 }
 0xb60   :  { %2986 = vmatpush3.bf16.msra.mxu0 %v2133_v44  ;;  %v2976_v49 = vpop.f32.mrb[86].mxu1 }
 0xb61   :  { %v2057_v50 = vpop.f32.mrb[87].mxu1 }
 0xb63   :  { %2988 = vmatmul.mubr.bf16.vlgmr.msra.gmra.mrb[96].mxu0 %v2141_v48 }
 0xb66   :  { %v2979_v51 = vpop.f32.mrb[88].mxu1 }
 0xb67   :  { %v2070_v52 = vpop.f32.mrb[89].mxu1 }
 0xb68   :  { %v2980_v53 = vpop.f32.mrb[90].mxu1 }
 0xb69   :  { %v2073_v54 = vpop.f32.mrb[91].mxu1 }
 0xb6e   :  { %v2983_v55 = vpop.f32.mrb[92].mxu1 }
 0xb6f   :  { %v2086_v16 = vpop.f32.mrb[93].mxu1 }
 0xb70   :  { %v2984_v56 = vpop.f32.mrb[94].mxu1 }
 0xb71   :  { %v2089_v57 = vpop.f32.mrb[95].mxu1 }
 0xc36   :  { %v2176_v59 = vpop.f32.mrb[96].mxu0 }
 0xc37   :  { %v2182_v3 = vpack.c.bf16 %v2176_v59, %v2176_v59  ;;  %v2989_v4 = vpop.f32.mrb[97].mxu0 }
 0xc38   :  { %v2179_v5 = vpop.f32.mrb[98].mxu0 }
 0xc39   :  { %v2990_v6 = vpop.f32.mrb[99].mxu0  ;;  %3008 = vmatmul.mubr.bf16.vlgmr.msra.gmra.mrb[96].mxu1 %v2182_v3 }
 0xd0c   :  { %v2290_v8 = vpop.f32.mrb[96].mxu1 }
 0xd0d   :  { %v2291_v9 = vadd.f32 %v2389_v7, %v2290_v8  ;;  %v3009_v10 = vpop.f32.mrb[97].mxu1 }
 0xd0e   :  { %v2293_v11 = vpop.f32.mrb[98].mxu1 }
 0xd0f   :  { %2296 = vst [vmem:[#allocation8] sm:$0xff] %v2291_v9  ;;  %v3010_v12 = vpop.f32.mrb[99].mxu1 }
 0xd10   :  { %3169 = shalt.err (!%p3166_p0)
}
 0xd11   :  { %s3170_s3 = scalar_lea.hbm %s3408_s4, 128 }
 0xd12   :  { %p3171_p1 = scmp.ne.s32.totalorder %s3408_s4, %s3170_s3  ;;  %p3174_p2 = scmp.lt.u32.totalorder %s3170_s3, %s3408_s4 }
 0xd14   :  { %p3176_p3 = pnand %p3174_p2, %p3171_p1 }
 0xd16   :  { %3179 = shalt.err (!%p3176_p3)
}
 0xd17   :  { %2306 = dma.vmem_to_hbm [thread:$0]  %s2304_s1, 128, %s3408_s4, [#allocation4]  }
 0xd18   :  { %3184 = dma.done.wait [#allocation4], 128  }
 0xd19   :  { %3185 = vsyncadd [#allocation4], 4294967168 }
 0xd1a   :  { %2310 = vsyncpa [#allocation3], 1 }
 0xd1b   :  { %2311 = vsyncpa [#allocation6], 1 }
 0xd1c   :  { %2312 = vsyncpa [#allocation4], 1 }

</bundles_post_ra>
